<compile_context>
chip_gen: v5e
topology: v5e:2x2
jax: 0.10.0
libtpu: 0.0.40
codegen_flags: <defaults>
</compile_context>

<pallas_src>
import functools

import jax
import jax.numpy as jnp
from jax import lax
from jax.experimental import pallas as pl
from jax.experimental.pallas import tpu as pltpu


def abmil_kernel(h_ref,                     # (TN, M)           instance-embedding tile
                 wvu_ref, bvu_ref,          # (M, 2*Lp), (1, 2*Lp) fused V|U gating proj
                 ww_ref, bw_ref,            # (K, Lp), (K, 1)   attention head
                 wc_ref, bc_ref,            # (M, C), (1, C)    classifier
                 attn_ref,                  # (T, TN) raw scores -> normalized attention
                 logits_ref, yprob_ref,     # (K, C), (K, C)
                 m_sc, l_sc, acc_sc,        # (K,1), (K,1), (K,M) online-softmax state
                 *, valid_in_last):
    i = pl.program_id(0)
    num_tiles = pl.num_programs(0)
    tn = h_ref.shape[0]
    lp = ww_ref.shape[1]                    # lane-group-aligned hidden size (mult of 128)

    @pl.when(i == 0)
    def _init():
        m_sc[...] = jnp.full(m_sc.shape, -jnp.inf, m_sc.dtype)
        l_sc[...] = jnp.zeros(l_sc.shape, l_sc.dtype)
        acc_sc[...] = jnp.zeros(acc_sc.shape, acc_sc.dtype)

    h = h_ref[...]                                                     # (TN, M)

    # Fused gating projection: one MXU pass over H for both branches.
    g = jnp.dot(h, wvu_ref[...],
                preferred_element_type=jnp.float32) + bvu_ref[...]     # (TN, 2*Lp) f32
    # lp is a multiple of 128 -> both slices are lane-tile-aligned pure views.
    gated = jnp.tanh(g[:, :lp]) * jax.nn.sigmoid(g[:, lp:])            # (TN, Lp)

    # Attention scores in lane-dense row layout: (K, TN) = Ww (K,Lp) . gated^T.
    scores = lax.dot_general(ww_ref[...], gated,
                             (((1,), (1,)), ((), ())),
                             preferred_element_type=jnp.float32) + bw_ref[...]

    def _accumulate(s):
        # Stash raw scores for this tile (normalized in place at the last step).
        attn_ref[pl.ds(i, 1), :] = s
        # Online-softmax accumulation of Z = softmax(scores) @ H.
        m_prev = m_sc[...]
        m_new = jnp.maximum(m_prev, jnp.max(s, axis=1, keepdims=True))
        alpha = jnp.exp(m_prev - m_new)                                # (K, 1)
        e = jnp.exp(s - m_new)                                         # (K, TN)
        l_sc[...] = alpha * l_sc[...] + jnp.sum(e, axis=1, keepdims=True)
        acc_sc[...] = alpha * acc_sc[...] + jnp.dot(
            e.astype(h.dtype), h, preferred_element_type=jnp.float32)
        m_sc[...] = m_new

    if valid_in_last < tn:
        # Static: padding exists.  Only the last tile can be partial, so the
        # iota/compare/select never touches the steady-state loop.
        @pl.when(i != num_tiles - 1)
        def _steady():
            _accumulate(scores)

        @pl.when(i == num_tiles - 1)
        def _tail():
            col = lax.broadcasted_iota(jnp.int32, scores.shape, 1)
            _accumulate(jnp.where(col < valid_in_last, scores, -jnp.inf))
    else:
        _accumulate(scores)

    @pl.when(i == num_tiles - 1)
    def _finalize():
        inv_l = pl.reciprocal(l_sc[...], approx=True)                  # (K, 1)
        # Normalize all stashed scores -> attention weights (lane-dense RMW).
        attn_ref[...] = jnp.exp(attn_ref[...] - m_sc[...]) * inv_l
        z = acc_sc[...] * inv_l                                        # (K, M)
        logits = jnp.dot(z, wc_ref[...],
                         preferred_element_type=jnp.float32) + bc_ref[...]
        logits_ref[...] = logits
        lm = jnp.max(logits, axis=1, keepdims=True)
        le = jnp.exp(logits - lm)
        # Tiny (K, C) softmax: exact divide (approx reciprocal buys nothing here).
        yprob_ref[...] = le / jnp.sum(le, axis=1, keepdims=True)


def _round_up(x, m):
    return (x + m - 1) // m * m


def abmil_forward(H, label, params, *, block_n=512, compute_dtype=None,
                  interpret=False):
    """ABMIL forward.  H: (N, M) bag of instance embeddings.

    Returns (logits, Y_prob, A, label) with A of shape (K, N), matching the
    PyTorch module.  `block_n` = instance rows per grid step (rounded to 128;
    size it down for v7x's 64 MiB VMEM, up to 1024-2048 on v6e for large M).
    `compute_dtype=jnp.bfloat16` casts the big matmul operands with f32
    accumulation; prefer producing H in bf16 upstream so the cast is fused
    (a standalone wrapper-side astype adds an HBM round trip).
    """
    N, M = H.shape
    assert N >= 1, "empty bag (N == 0) is not supported"
    Wv, bv = params["Wv"], params["bv"]      # (M, L), (1, L)
    Wu, bu = params["Wu"], params["bu"]      # (M, L), (1, L)
    Ww, bw = params["Ww"], params["bw"]      # (K, L), (K, 1)
    Wc, bc = params["Wc"], params["bc"]      # (M*K, C), (1, C)
    K, L = Ww.shape
    C = Wc.shape[1]
    assert K == 1, "torch ABMIL classifier layout assumes attention_heads == 1"

    # Fuse the two gating projections into one (M, 2*Lp) operand with the V and
    # U halves each zero-padded to a 128-lane-aligned width Lp.
    Lp = _round_up(L, 128)
    Wvu = jnp.zeros((M, 2 * Lp), jnp.float32)
    Wvu = Wvu.at[:, :L].set(Wv).at[:, Lp:Lp + L].set(Wu)
    bvu = jnp.zeros((1, 2 * Lp), jnp.float32)
    bvu = bvu.at[:, :L].set(bv).at[:, Lp:Lp + L].set(bu)
    Ww_p = jnp.zeros((K, Lp), jnp.float32).at[:, :L].set(Ww)

    # Instance tiling: 128-aligned tiles, padded rows masked on the last step.
    tn = min(_round_up(max(block_n, 128), 128), _round_up(N, 128))
    num_tiles = -(-N // tn)
    n_pad = num_tiles * tn
    valid_in_last = N - (num_tiles - 1) * tn
    if n_pad != N:
        H = jnp.pad(H, ((0, n_pad - N), (0, 0)))

    if compute_dtype is not None:
        h_in, wvu_in = H.astype(compute_dtype), Wvu.astype(compute_dtype)
    else:
        h_in, wvu_in = H, Wvu

    kernel = functools.partial(abmil_kernel, valid_in_last=valid_in_last)

    grid_spec = pltpu.PrefetchScalarGridSpec(
        num_scalar_prefetch=0,
        grid=(num_tiles,),
        in_specs=[
            pl.BlockSpec((tn, M), lambda i: (i, 0)),           # H tile (pipelined)
            pl.BlockSpec((M, 2 * Lp), lambda i: (0, 0)),       # fused gating weight
            pl.BlockSpec((1, 2 * Lp), lambda i: (0, 0)),       # fused gating bias
            pl.BlockSpec((K, Lp), lambda i: (0, 0)),           # attention_w weight
            pl.BlockSpec((K, 1), lambda i: (0, 0)),            # attention_w bias
            pl.BlockSpec((M * K, C), lambda i: (0, 0)),        # classifier weight
            pl.BlockSpec((1, C), lambda i: (0, 0)),            # classifier bias
        ],
        out_specs=(
            pl.BlockSpec((num_tiles, tn), lambda i: (0, 0)),   # attention (resident)
            pl.BlockSpec((K, C), lambda i: (0, 0)),            # logits
            pl.BlockSpec((K, C), lambda i: (0, 0)),            # Y_prob
        ),
        scratch_shapes=[
            pltpu.VMEM((K, 1), jnp.float32),     # running max
            pltpu.VMEM((K, 1), jnp.float32),     # running sum-of-exp
            pltpu.VMEM((K, M), jnp.float32),     # running exp-weighted sum of H
        ],
    )

    in_bytes = h_in.dtype.itemsize
    weights_bytes = (M * 2 * Lp + 2 * Lp + K * Lp + K + M * C + C) * 4
    cost = pl.CostEstimate(
        flops=int(n_pad * (4 * M * Lp + 2 * Lp * K + 2 * M * K) + 2 * K * M * C),
        transcendentals=int(n_pad * (2 * Lp + K) + K * C),
        bytes_accessed=int(n_pad * M * in_bytes + weights_bytes
                           + 2 * n_pad * 4 + 4 * K * C * 4),
    )

    # Explicit VMEM budget: 2x double-buffered H tile + resident weights +
    # resident attention buffer + scratch.  Only raise the scoped limit when
    # the default 32 MiB is insufficient (v6e large tiles); on v7x prefer a
    # smaller block_n over pushing past ~48 MiB.
    vmem_need = (2 * tn * M * in_bytes
                 + 2 * weights_bytes
                 + _round_up(num_tiles, 8) * tn * 4
                 + (K * M + 2 * K + 4 * K * C) * 4)
    compiler_kwargs = {}
    if vmem_need > (32 << 20):
        compiler_kwargs["vmem_limit_bytes"] = min(vmem_need * 5 // 4, 100 << 20)

    attn_raw, logits, yprob = pl.pallas_call(
        kernel,
        out_shape=(
            jax.ShapeDtypeStruct((num_tiles, tn), jnp.float32),
            jax.ShapeDtypeStruct((K, C), jnp.float32),
            jax.ShapeDtypeStruct((K, C), jnp.float32),
        ),
        grid_spec=grid_spec,
        compiler_params=pltpu.CompilerParams(
            dimension_semantics=("arbitrary",),   # sequential reduction over tiles
            **compiler_kwargs),
        cost_estimate=cost,
        interpret=interpret,
    )(h_in, wvu_in, bvu, Ww_p, bw, Wc, bc)

    # (num_tiles, tn) row-major == (K, n_pad) for K == 1: metadata-only reshape,
    # then drop the padded instances.
    A = attn_raw.reshape(K, n_pad)[:, :N]
    return logits, yprob, A, label


def init_params(key, M, L, K, C):
    """PyTorch-Linear-like uniform init, stored in kernel-friendly layouts."""
    ks = jax.random.split(key, 8)

    def lin(kw, kb, fan_in, w_shape, b_shape):
        bound = 1.0 / float(fan_in) ** 0.5
        W = jax.random.uniform(kw, w_shape, jnp.float32, -bound, bound)
        b = jax.random.uniform(kb, b_shape, jnp.float32, -bound, bound)
        return W, b

    Wv, bv = lin(ks[0], ks[1], M, (M, L), (1, L))            # attention_V (pre-transposed)
    Wu, bu = lin(ks[2], ks[3], M, (M, L), (1, L))            # attention_U (pre-transposed)
    Ww, bw = lin(ks[4], ks[5], L, (K, L), (K, 1))            # attention_w (torch layout)
    Wc, bc = lin(ks[6], ks[7], M * K, (M * K, C), (1, C))    # classifier (pre-transposed)
    return dict(Wv=Wv, bv=bv, Wu=Wu, bu=bu, Ww=Ww, bw=bw, Wc=Wc, bc=bc)


def abmil_reference(H, params):
    """Pure-JAX reference mirroring the PyTorch forward (for validation)."""
    A_V = jnp.tanh(H @ params["Wv"] + params["bv"])                 # (N, L)
    A_U = jax.nn.sigmoid(H @ params["Wu"] + params["bu"])           # (N, L)
    scores = (A_V * A_U) @ params["Ww"].T + params["bw"].T          # (N, K)
    A = jax.nn.softmax(scores.T, axis=1)                            # (K, N)
    Z = A @ H                                                       # (K, M)
    logits = Z @ params["Wc"] + params["bc"]                        # (K, C)
    Y_prob = jax.nn.softmax(logits, axis=1)
    return logits, Y_prob, A


if __name__ == "__main__":
    # Small ABMIL config: embedding M=64, hidden L=64, K=1 head, C=2 classes,
    # bag of N=300 instances.  block_n=128 exercises the multi-tile grid, the
    # resident attention buffer, and the last-tile padding mask.
    N, M, L, K, C = 300, 64, 64, 1, 2

    key = jax.random.PRNGKey(0)
    k_h, k_p = jax.random.split(key)
    H = jax.random.normal(k_h, (N, M), dtype=jnp.float32)
    label = jnp.array([1], dtype=jnp.int32)
    params = init_params(k_p, M, L, K, C)

    logits, yprob, A, lbl = abmil_forward(H, label, params, block_n=128)
    jax.block_until_ready((logits, yprob, A, lbl))

    assert logits.shape == (K, C)
    assert yprob.shape == (K, C)
    assert A.shape == (K, N)

    ref_logits, ref_yprob, ref_A = abmil_reference(H, params)
    assert jnp.allclose(logits, ref_logits, rtol=5e-3, atol=5e-4), "logits mismatch"
    assert jnp.allclose(yprob, ref_yprob, rtol=5e-3, atol=5e-4), "Y_prob mismatch"
    assert jnp.allclose(A, ref_A, rtol=5e-3, atol=1e-5), "attention mismatch"
    assert abs(float(jnp.sum(A)) - 1.0) < 1e-3, "attention does not sum to 1"
    assert abs(float(jnp.sum(yprob)) - 1.0) < 1e-4, "Y_prob does not sum to 1"

    print("KERNEL_OK")
</pallas_src>

<mosaic_0001>
module attributes {stable_mosaic.version = 11 : i64} {
  func.func @abmil_kernel(%arg0: i32, %arg1: memref<128x64xf32, #tpu.memory_space<vmem>>, %arg2: memref<64x256xf32, #tpu.memory_space<vmem>>, %arg3: memref<1x256xf32, #tpu.memory_space<vmem>>, %arg4: memref<1x128xf32, #tpu.memory_space<vmem>>, %arg5: memref<1x1xf32, #tpu.memory_space<vmem>>, %arg6: memref<64x2xf32, #tpu.memory_space<vmem>>, %arg7: memref<1x2xf32, #tpu.memory_space<vmem>>, %arg8: memref<3x128xf32, #tpu.memory_space<vmem>>, %arg9: memref<1x2xf32, #tpu.memory_space<vmem>>, %arg10: memref<1x2xf32, #tpu.memory_space<vmem>>, %arg11: memref<1x1xf32, #tpu.memory_space<vmem>>, %arg12: memref<1x1xf32, #tpu.memory_space<vmem>>, %arg13: memref<1x64xf32, #tpu.memory_space<vmem>>) attributes {dimension_semantics = [#tpu.dimension_semantics<arbitrary>], iteration_bounds = array<i64: 3>, scalar_prefetch = 0 : i64, scratch_operands = 3 : i64, tpu.core_type = #tpu.core_type<tc>, window_params = [{transform_indices = @transform_0, window_bounds = array<i64: 128, 64>}, {pipeline_mode = #tpu.pipeline_mode<synchronous>, transform_indices = @transform_1, window_bounds = array<i64: 64, 256>}, {pipeline_mode = #tpu.pipeline_mode<synchronous>, transform_indices = @transform_2, window_bounds = array<i64: 1, 256>}, {pipeline_mode = #tpu.pipeline_mode<synchronous>, transform_indices = @transform_3, window_bounds = array<i64: 1, 128>}, {pipeline_mode = #tpu.pipeline_mode<synchronous>, transform_indices = @transform_4, window_bounds = array<i64: 1, 1>}, {pipeline_mode = #tpu.pipeline_mode<synchronous>, transform_indices = @transform_5, window_bounds = array<i64: 64, 2>}, {pipeline_mode = #tpu.pipeline_mode<synchronous>, transform_indices = @transform_6, window_bounds = array<i64: 1, 2>}, {pipeline_mode = #tpu.pipeline_mode<synchronous>, transform_indices = @transform_7, window_bounds = array<i64: 3, 128>}, {pipeline_mode = #tpu.pipeline_mode<synchronous>, transform_indices = @transform_8, window_bounds = array<i64: 1, 2>}, {pipeline_mode = #tpu.pipeline_mode<synchronous>, transform_indices = @transform_9, window_bounds = array<i64: 1, 2>}]} {
    %c0_i32 = arith.constant 0 : i32
    %0 = arith.cmpi eq, %arg0, %c0_i32 : i32
    %1 = arith.extui %0 : i1 to i32
    %c0_i32_0 = arith.constant 0 : i32
    %2 = arith.cmpi ne, %1, %c0_i32_0 : i32
    scf.if %2 {
      %cst_17 = arith.constant 0xFF800000 : f32
      %32 = vector.broadcast %cst_17 : f32 to vector<1x1xf32>
      %c0_18 = arith.constant 0 : index
      %c0_19 = arith.constant 0 : index
      %33 = vector.load %arg11[%c0_18, %c0_19] : memref<1x1xf32, #tpu.memory_space<vmem>>, vector<1x1xf32>
      tpu.vector_store %arg11[%c0_18, %c0_19], %32 {strides = array<i32>} : memref<1x1xf32, #tpu.memory_space<vmem>>, vector<1x1xf32>,
      %cst_20 = arith.constant 0.000000e+00 : f32
      %34 = vector.broadcast %cst_20 : f32 to vector<1x1xf32>
      %c0_21 = arith.constant 0 : index
      %c0_22 = arith.constant 0 : index
      %35 = vector.load %arg12[%c0_21, %c0_22] : memref<1x1xf32, #tpu.memory_space<vmem>>, vector<1x1xf32>
      tpu.vector_store %arg12[%c0_21, %c0_22], %34 {strides = array<i32>} : memref<1x1xf32, #tpu.memory_space<vmem>>, vector<1x1xf32>,
      %cst_23 = arith.constant 0.000000e+00 : f32
      %36 = vector.broadcast %cst_23 : f32 to vector<1x64xf32>
      %c0_24 = arith.constant 0 : index
      %c0_25 = arith.constant 0 : index
      %37 = vector.load %arg13[%c0_24, %c0_25] : memref<1x64xf32, #tpu.memory_space<vmem>>, vector<1x64xf32>
      tpu.vector_store %arg13[%c0_24, %c0_25], %36 {strides = array<i32>} : memref<1x64xf32, #tpu.memory_space<vmem>>, vector<1x64xf32>,
    } else {
    }
    %c0 = arith.constant 0 : index
    %c0_1 = arith.constant 0 : index
    %3 = vector.load %arg1[%c0, %c0_1] : memref<128x64xf32, #tpu.memory_space<vmem>>, vector<128x64xf32>
    %c0_2 = arith.constant 0 : index
    %c0_3 = arith.constant 0 : index
    %4 = vector.load %arg2[%c0_2, %c0_3] : memref<64x256xf32, #tpu.memory_space<vmem>>, vector<64x256xf32>
    %cst = arith.constant dense<0.000000e+00> : vector<128x256xf32>
    %5 = tpu.matmul %3, %4, %cst {dimension_numbers = #tpu.dot_dimension_numbers<[1], [0], [0], [1], [0, 0, 1, 1], [], []>} : vector<128x64xf32>, vector<64x256xf32>, vector<128x256xf32> -> vector<128x256xf32>
    %c0_4 = arith.constant 0 : index
    %c0_5 = arith.constant 0 : index
    %6 = vector.load %arg3[%c0_4, %c0_5] : memref<1x256xf32, #tpu.memory_space<vmem>>, vector<1x256xf32>
    %7 = vector.broadcast %6 : vector<1x256xf32> to vector<128x256xf32>
    %8 = arith.addf %5, %7 : vector<128x256xf32>
    %9 = vector.extract_strided_slice %8 {offsets = [0, 0], sizes = [128, 128], strides = [1, 1]} : vector<128x256xf32> to vector<128x128xf32>
    %10 = math.tanh %9 : vector<128x128xf32>
    %11 = vector.extract_strided_slice %8 {offsets = [0, 128], sizes = [128, 128], strides = [1, 1]} : vector<128x256xf32> to vector<128x128xf32>
    %12 = arith.negf %11 : vector<128x128xf32>
    %13 = math.exp %12 : vector<128x128xf32>
    %cst_6 = arith.constant 1.000000e+00 : f32
    %14 = vector.broadcast %cst_6 : f32 to vector<128x128xf32>
    %15 = arith.addf %14, %13 : vector<128x128xf32>
    %16 = arith.divf %14, %15 : vector<128x128xf32>
    %17 = arith.mulf %10, %16 : vector<128x128xf32>
    %c0_7 = arith.constant 0 : index
    %c0_8 = arith.constant 0 : index
    %18 = vector.load %arg4[%c0_7, %c0_8] : memref<1x128xf32, #tpu.memory_space<vmem>>, vector<1x128xf32>
    %cst_9 = arith.constant dense<0.000000e+00> : vector<1x128xf32>
    %19 = tpu.matmul %18, %17, %cst_9 {dimension_numbers = #tpu.dot_dimension_numbers<[1], [1], [0], [0], [0, 0, 1, 0], [], []>} : vector<1x128xf32>, vector<128x128xf32>, vector<1x128xf32> -> vector<1x128xf32>
    %c0_10 = arith.constant 0 : index
    %c0_11 = arith.constant 0 : index
    %20 = vector.load %arg5[%c0_10, %c0_11] : memref<1x1xf32, #tpu.memory_space<vmem>>, vector<1x1xf32>
    %21 = vector.broadcast %20 : vector<1x1xf32> to vector<1x128xf32>
    %22 = arith.addf %19, %21 : vector<1x128xf32>
    %c2_i32 = arith.constant 2 : i32
    %23 = arith.cmpi ne, %arg0, %c2_i32 : i32
    %24 = arith.extui %23 : i1 to i32
    %c0_i32_12 = arith.constant 0 : i32
    %25 = arith.cmpi ne, %24, %c0_i32_12 : i32
    scf.if %25 {
      %32 = arith.index_cast %arg0 : i32 to index
      %c0_17 = arith.constant 0 : index
      %33 = vector.load %arg8[%32, %c0_17] : memref<3x128xf32, #tpu.memory_space<vmem>>, vector<1x128xf32>
      tpu.vector_store %arg8[%32, %c0_17], %22 {strides = array<i32>} : memref<3x128xf32, #tpu.memory_space<vmem>>, vector<1x128xf32>,
      %c0_18 = arith.constant 0 : index
      %c0_19 = arith.constant 0 : index
      %34 = vector.load %arg11[%c0_18, %c0_19] : memref<1x1xf32, #tpu.memory_space<vmem>>, vector<1x1xf32>
      %cst_20 = arith.constant dense<0xFF800000> : vector<1xf32>
      %35 = vector.multi_reduction <maximumf>, %22, %cst_20 [1] : vector<1x128xf32> to vector<1xf32>
      %36 = vector.shape_cast %35 : vector<1xf32> to vector<1x1xf32>
      %37 = arith.maximumf %34, %36 : vector<1x1xf32>
      %38 = arith.subf %34, %37 : vector<1x1xf32>
      %39 = math.exp %38 : vector<1x1xf32>
      %40 = vector.broadcast %37 : vector<1x1xf32> to vector<1x128xf32>
      %41 = arith.subf %22, %40 : vector<1x128xf32>
      %42 = math.exp %41 : vector<1x128xf32>
      %c0_21 = arith.constant 0 : index
      %c0_22 = arith.constant 0 : index
      %43 = vector.load %arg12[%c0_21, %c0_22] : memref<1x1xf32, #tpu.memory_space<vmem>>, vector<1x1xf32>
      %44 = arith.mulf %39, %43 : vector<1x1xf32>
      %cst_23 = arith.constant dense<0.000000e+00> : vector<1xf32>
      %45 = vector.multi_reduction <add>, %42, %cst_23 [1] : vector<1x128xf32> to vector<1xf32>
      %46 = vector.shape_cast %45 : vector<1xf32> to vector<1x1xf32>
      %47 = arith.addf %44, %46 : vector<1x1xf32>
      %c0_24 = arith.constant 0 : index
      %c0_25 = arith.constant 0 : index
      %48 = vector.load %arg12[%c0_24, %c0_25] : memref<1x1xf32, #tpu.memory_space<vmem>>, vector<1x1xf32>
      tpu.vector_store %arg12[%c0_24, %c0_25], %47 {strides = array<i32>} : memref<1x1xf32, #tpu.memory_space<vmem>>, vector<1x1xf32>,
      %c0_26 = arith.constant 0 : index
      %c0_27 = arith.constant 0 : index
      %49 = vector.load %arg13[%c0_26, %c0_27] : memref<1x64xf32, #tpu.memory_space<vmem>>, vector<1x64xf32>
      %50 = vector.broadcast %39 : vector<1x1xf32> to vector<1x64xf32>
      %51 = arith.mulf %50, %49 : vector<1x64xf32>
      %cst_28 = arith.constant dense<0.000000e+00> : vector<1x64xf32>
      %52 = tpu.matmul %42, %3, %cst_28 {dimension_numbers = #tpu.dot_dimension_numbers<[1], [0], [0], [1], [0, 0, 1, 1], [], []>} : vector<1x128xf32>, vector<128x64xf32>, vector<1x64xf32> -> vector<1x64xf32>
      %53 = arith.addf %51, %52 : vector<1x64xf32>
      %c0_29 = arith.constant 0 : index
      %c0_30 = arith.constant 0 : index
      %54 = vector.load %arg13[%c0_29, %c0_30] : memref<1x64xf32, #tpu.memory_space<vmem>>, vector<1x64xf32>
      tpu.vector_store %arg13[%c0_29, %c0_30], %53 {strides = array<i32>} : memref<1x64xf32, #tpu.memory_space<vmem>>, vector<1x64xf32>,
      %c0_31 = arith.constant 0 : index
      %c0_32 = arith.constant 0 : index
      %55 = vector.load %arg11[%c0_31, %c0_32] : memref<1x1xf32, #tpu.memory_space<vmem>>, vector<1x1xf32>
      tpu.vector_store %arg11[%c0_31, %c0_32], %37 {strides = array<i32>} : memref<1x1xf32, #tpu.memory_space<vmem>>, vector<1x1xf32>,
    } else {
    }
    %c2_i32_13 = arith.constant 2 : i32
    %26 = arith.cmpi eq, %arg0, %c2_i32_13 : i32
    %27 = arith.extui %26 : i1 to i32
    %c0_i32_14 = arith.constant 0 : i32
    %28 = arith.cmpi ne, %27, %c0_i32_14 : i32
    scf.if %28 {
      %32 = tpu.iota {dimensions = array<i32: 1>} : vector<1x128xi32>
      %c44_i32 = arith.constant 44 : i32
      %33 = vector.broadcast %c44_i32 : i32 to vector<1x128xi32>
      %34 = arith.cmpi slt, %32, %33 : vector<1x128xi32>
      %cst_17 = arith.constant 0xFF800000 : f32
      %35 = vector.broadcast %cst_17 : f32 to vector<1x128xf32>
      %36 = arith.select %34, %22, %35 : vector<1x128xi1>, vector<1x128xf32>
      %37 = arith.index_cast %arg0 : i32 to index
      %c0_18 = arith.constant 0 : index
      %38 = vector.load %arg8[%37, %c0_18] : memref<3x128xf32, #tpu.memory_space<vmem>>, vector<1x128xf32>
      tpu.vector_store %arg8[%37, %c0_18], %36 {strides = array<i32>} : memref<3x128xf32, #tpu.memory_space<vmem>>, vector<1x128xf32>,
      %c0_19 = arith.constant 0 : index
      %c0_20 = arith.constant 0 : index
      %39 = vector.load %arg11[%c0_19, %c0_20] : memref<1x1xf32, #tpu.memory_space<vmem>>, vector<1x1xf32>
      %cst_21 = arith.constant dense<0xFF800000> : vector<1xf32>
      %40 = vector.multi_reduction <maximumf>, %36, %cst_21 [1] : vector<1x128xf32> to vector<1xf32>
      %41 = vector.shape_cast %40 : vector<1xf32> to vector<1x1xf32>
      %42 = arith.maximumf %39, %41 : vector<1x1xf32>
      %43 = arith.subf %39, %42 : vector<1x1xf32>
      %44 = math.exp %43 : vector<1x1xf32>
      %45 = vector.broadcast %42 : vector<1x1xf32> to vector<1x128xf32>
      %46 = arith.subf %36, %45 : vector<1x128xf32>
      %47 = math.exp %46 : vector<1x128xf32>
      %c0_22 = arith.constant 0 : index
      %c0_23 = arith.constant 0 : index
      %48 = vector.load %arg12[%c0_22, %c0_23] : memref<1x1xf32, #tpu.memory_space<vmem>>, vector<1x1xf32>
      %49 = arith.mulf %44, %48 : vector<1x1xf32>
      %cst_24 = arith.constant dense<0.000000e+00> : vector<1xf32>
      %50 = vector.multi_reduction <add>, %47, %cst_24 [1] : vector<1x128xf32> to vector<1xf32>
      %51 = vector.shape_cast %50 : vector<1xf32> to vector<1x1xf32>
      %52 = arith.addf %49, %51 : vector<1x1xf32>
      %c0_25 = arith.constant 0 : index
      %c0_26 = arith.constant 0 : index
      %53 = vector.load %arg12[%c0_25, %c0_26] : memref<1x1xf32, #tpu.memory_space<vmem>>, vector<1x1xf32>
      tpu.vector_store %arg12[%c0_25, %c0_26], %52 {strides = array<i32>} : memref<1x1xf32, #tpu.memory_space<vmem>>, vector<1x1xf32>,
      %c0_27 = arith.constant 0 : index
      %c0_28 = arith.constant 0 : index
      %54 = vector.load %arg13[%c0_27, %c0_28] : memref<1x64xf32, #tpu.memory_space<vmem>>, vector<1x64xf32>
      %55 = vector.broadcast %44 : vector<1x1xf32> to vector<1x64xf32>
      %56 = arith.mulf %55, %54 : vector<1x64xf32>
      %cst_29 = arith.constant dense<0.000000e+00> : vector<1x64xf32>
      %57 = tpu.matmul %47, %3, %cst_29 {dimension_numbers = #tpu.dot_dimension_numbers<[1], [0], [0], [1], [0, 0, 1, 1], [], []>} : vector<1x128xf32>, vector<128x64xf32>, vector<1x64xf32> -> vector<1x64xf32>
      %58 = arith.addf %56, %57 : vector<1x64xf32>
      %c0_30 = arith.constant 0 : index
      %c0_31 = arith.constant 0 : index
      %59 = vector.load %arg13[%c0_30, %c0_31] : memref<1x64xf32, #tpu.memory_space<vmem>>, vector<1x64xf32>
      tpu.vector_store %arg13[%c0_30, %c0_31], %58 {strides = array<i32>} : memref<1x64xf32, #tpu.memory_space<vmem>>, vector<1x64xf32>,
      %c0_32 = arith.constant 0 : index
      %c0_33 = arith.constant 0 : index
      %60 = vector.load %arg11[%c0_32, %c0_33] : memref<1x1xf32, #tpu.memory_space<vmem>>, vector<1x1xf32>
      tpu.vector_store %arg11[%c0_32, %c0_33], %42 {strides = array<i32>} : memref<1x1xf32, #tpu.memory_space<vmem>>, vector<1x1xf32>,
    } else {
    }
    %c2_i32_15 = arith.constant 2 : i32
    %29 = arith.cmpi eq, %arg0, %c2_i32_15 : i32
    %30 = arith.extui %29 : i1 to i32
    %c0_i32_16 = arith.constant 0 : i32
    %31 = arith.cmpi ne, %30, %c0_i32_16 : i32
    scf.if %31 {
      %c0_17 = arith.constant 0 : index
      %c0_18 = arith.constant 0 : index
      %32 = vector.load %arg12[%c0_17, %c0_18] : memref<1x1xf32, #tpu.memory_space<vmem>>, vector<1x1xf32>
      %33 = tpu.reciprocal %32 {approx = true} : vector<1x1xf32> -> vector<1x1xf32>
      %c0_19 = arith.constant 0 : index
      %c0_20 = arith.constant 0 : index
      %34 = vector.load %arg8[%c0_19, %c0_20] : memref<3x128xf32, #tpu.memory_space<vmem>>, vector<3x128xf32>
      %c0_21 = arith.constant 0 : index
      %c0_22 = arith.constant 0 : index
      %35 = vector.load %arg11[%c0_21, %c0_22] : memref<1x1xf32, #tpu.memory_space<vmem>>, vector<1x1xf32>
      %36 = vector.broadcast %35 : vector<1x1xf32> to vector<3x128xf32>
      %37 = arith.subf %34, %36 : vector<3x128xf32>
      %38 = math.exp %37 : vector<3x128xf32>
      %39 = vector.broadcast %33 : vector<1x1xf32> to vector<3x128xf32>
      %40 = arith.mulf %38, %39 : vector<3x128xf32>
      %c0_23 = arith.constant 0 : index
      %c0_24 = arith.constant 0 : index
      %41 = vector.load %arg8[%c0_23, %c0_24] : memref<3x128xf32, #tpu.memory_space<vmem>>, vector<3x128xf32>
      tpu.vector_store %arg8[%c0_23, %c0_24], %40 {strides = array<i32>} : memref<3x128xf32, #tpu.memory_space<vmem>>, vector<3x128xf32>,
      %c0_25 = arith.constant 0 : index
      %c0_26 = arith.constant 0 : index
      %42 = vector.load %arg13[%c0_25, %c0_26] : memref<1x64xf32, #tpu.memory_space<vmem>>, vector<1x64xf32>
      %43 = vector.broadcast %33 : vector<1x1xf32> to vector<1x64xf32>
      %44 = arith.mulf %42, %43 : vector<1x64xf32>
      %c0_27 = arith.constant 0 : index
      %c0_28 = arith.constant 0 : index
      %45 = vector.load %arg6[%c0_27, %c0_28] : memref<64x2xf32, #tpu.memory_space<vmem>>, vector<64x2xf32>
      %cst_29 = arith.constant dense<0.000000e+00> : vector<1x2xf32>
      %46 = tpu.matmul %44, %45, %cst_29 {dimension_numbers = #tpu.dot_dimension_numbers<[1], [0], [0], [1], [0, 0, 1, 1], [], []>} : vector<1x64xf32>, vector<64x2xf32>, vector<1x2xf32> -> vector<1x2xf32>
      %c0_30 = arith.constant 0 : index
      %c0_31 = arith.constant 0 : index
      %47 = vector.load %arg7[%c0_30, %c0_31] : memref<1x2xf32, #tpu.memory_space<vmem>>, vector<1x2xf32>
      %48 = arith.addf %46, %47 : vector<1x2xf32>
      %c0_32 = arith.constant 0 : index
      %c0_33 = arith.constant 0 : index
      %49 = vector.load %arg9[%c0_32, %c0_33] : memref<1x2xf32, #tpu.memory_space<vmem>>, vector<1x2xf32>
      tpu.vector_store %arg9[%c0_32, %c0_33], %48 {strides = array<i32>} : memref<1x2xf32, #tpu.memory_space<vmem>>, vector<1x2xf32>,
      %cst_34 = arith.constant dense<0xFF800000> : vector<1xf32>
      %50 = vector.multi_reduction <maximumf>, %48, %cst_34 [1] : vector<1x2xf32> to vector<1xf32>
      %51 = vector.shape_cast %50 : vector<1xf32> to vector<1x1xf32>
      %52 = vector.broadcast %51 : vector<1x1xf32> to vector<1x2xf32>
      %53 = arith.subf %48, %52 : vector<1x2xf32>
      %54 = math.exp %53 : vector<1x2xf32>
      %cst_35 = arith.constant dense<0.000000e+00> : vector<1xf32>
      %55 = vector.multi_reduction <add>, %54, %cst_35 [1] : vector<1x2xf32> to vector<1xf32>
      %56 = vector.shape_cast %55 : vector<1xf32> to vector<1x1xf32>
      %57 = vector.broadcast %56 : vector<1x1xf32> to vector<1x2xf32>
      %58 = arith.divf %54, %57 : vector<1x2xf32>
      %c0_36 = arith.constant 0 : index
      %c0_37 = arith.constant 0 : index
      %59 = vector.load %arg10[%c0_36, %c0_37] : memref<1x2xf32, #tpu.memory_space<vmem>>, vector<1x2xf32>
      tpu.vector_store %arg10[%c0_36, %c0_37], %58 {strides = array<i32>} : memref<1x2xf32, #tpu.memory_space<vmem>>, vector<1x2xf32>,
    } else {
    }
    return
  }
  func.func @transform_0(%arg0: i32) -> (i32, i32) {
    %c0_i32 = arith.constant 0 : i32
    %c0_i32_0 = arith.constant 0 : i32
    return %arg0, %c0_i32 : i32, i32
  }
  func.func @transform_1(%arg0: i32) -> (i32, i32) {
    %c0_i32 = arith.constant 0 : i32
    %c0_i32_0 = arith.constant 0 : i32
    %c0_i32_1 = arith.constant 0 : i32
    return %c0_i32, %c0_i32_0 : i32, i32
  }
  func.func @transform_2(%arg0: i32) -> (i32, i32) {
    %c0_i32 = arith.constant 0 : i32
    %c0_i32_0 = arith.constant 0 : i32
    %c0_i32_1 = arith.constant 0 : i32
    return %c0_i32, %c0_i32_0 : i32, i32
  }
  func.func @transform_3(%arg0: i32) -> (i32, i32) {
    %c0_i32 = arith.constant 0 : i32
    %c0_i32_0 = arith.constant 0 : i32
    %c0_i32_1 = arith.constant 0 : i32
    return %c0_i32, %c0_i32_0 : i32, i32
  }
  func.func @transform_4(%arg0: i32) -> (i32, i32) {
    %c0_i32 = arith.constant 0 : i32
    %c0_i32_0 = arith.constant 0 : i32
    %c0_i32_1 = arith.constant 0 : i32
    return %c0_i32, %c0_i32_0 : i32, i32
  }
  func.func @transform_5(%arg0: i32) -> (i32, i32) {
    %c0_i32 = arith.constant 0 : i32
    %c0_i32_0 = arith.constant 0 : i32
    %c0_i32_1 = arith.constant 0 : i32
    return %c0_i32, %c0_i32_0 : i32, i32
  }
  func.func @transform_6(%arg0: i32) -> (i32, i32) {
    %c0_i32 = arith.constant 0 : i32
    %c0_i32_0 = arith.constant 0 : i32
    %c0_i32_1 = arith.constant 0 : i32
    return %c0_i32, %c0_i32_0 : i32, i32
  }
  func.func @transform_7(%arg0: i32) -> (i32, i32) {
    %c0_i32 = arith.constant 0 : i32
    %c0_i32_0 = arith.constant 0 : i32
    %c0_i32_1 = arith.constant 0 : i32
    return %c0_i32, %c0_i32_0 : i32, i32
  }
  func.func @transform_8(%arg0: i32) -> (i32, i32) {
    %c0_i32 = arith.constant 0 : i32
    %c0_i32_0 = arith.constant 0 : i32
    %c0_i32_1 = arith.constant 0 : i32
    return %c0_i32, %c0_i32_0 : i32, i32
  }
  func.func @transform_9(%arg0: i32) -> (i32, i32) {
    %c0_i32 = arith.constant 0 : i32
    %c0_i32_0 = arith.constant 0 : i32
    %c0_i32_1 = arith.constant 0 : i32
    return %c0_i32, %c0_i32_0 : i32, i32
  }
}

</mosaic_0001>

<bundles_post_ra>
// kernel: tpu_custom_call.1
= control target key start
LH: loop header
LB: loop body
LE: loop exit
PB: predicated region body
PF: predicated region fallthrough
CT: control target
= control target key end

     0   :  { %s2366_s0 = inlined_call_operand.vmem [shape: f32[384,64], index: 0, kind: input, shape index: {}]   ;;  %s2367_s1 = inlined_call_operand.vmem [shape: f32[64,256], index: 1, kind: input, shape index: {}]   ;;  %s2368_s2 = inlined_call_operand.vmem [shape: f32[1,256], index: 2, kind: input, shape index: {}]   ;;  %s2369_s3 = inlined_call_operand.vmem [shape: f32[1,128], index: 3, kind: input, shape index: {}]   ;;  %s2370_s4 = inlined_call_operand.<no memory space> [shape: f32[1,1], index: 4, kind: input, shape index: {}]   ;;  %s2371_s5 = inlined_call_operand.vmem [shape: f32[64,2], index: 5, kind: input, shape index: {}]   ;;  %s2372_s6 = inlined_call_operand.vmem [shape: f32[1,2], index: 6, kind: input, shape index: {}]   ;;  %s2373_s7 = inlined_call_operand.hbm [shape: f32[3,128], index: 7, kind: output, shape index: {0}]   ;;  %s2374_s8 = inlined_call_operand.hbm [shape: f32[1,2], index: 8, kind: output, shape index: {1}]   ;;  %s2375_s9 = inlined_call_operand.hbm [shape: f32[1,2], index: 9, kind: output, shape index: {2}]  }
   0x1   :  { %v15_v0 = vstv %s2370_s4 }
   0x2   :  { %16 = vst [vmem:[#allocation5] sm:$0x1] %v15_v0 }
   0x3   :  { %17 = vsyncpa [#allocation7], 0 }
   0x4   :  { %18 = vsyncpa [#allocation9], 0  ;;  %s1629_s11 = smov 0  }
   0x5 LB: > { %s1635_s12 = sadd.s32 4294967295, %s1566_s11   ;;  %p1228_p0 = scmp.ge.s32.totalorder %s1566_s11, 1  ;;  %s1566_s11 = sphi %s1629_s11, %s24_s11  }
   0x6   : > { %p282_p1 = scmp.lt.s32.totalorder %s1566_s11, 4 }
   0x8   : > { %p283_p2 = pnand %p1228_p0, %p282_p1 }
   0xa   : > { %286 = sbr.rel (%p283_p2) target bundleno = 1715 (0x6b3), region = 48 }
   0xf   : > { %s1229_s4 = sshll.u32 %s1635_s12, 4  ;;  %p1231_p4 = scmp.ne.s32.totalorder %s1635_s12, 0 }
  0x10   : > { %p314_p3 = scmp.lt.s32.totalorder %s1229_s4, 47 }
  0x11   : > { %322 = sbr.rel (%p1231_p4) target bundleno = 26 (0x1a), region = 52 }
  0x12   : > { %s2455_s4 = smov (!%p314_p3, %s1229_s4), 47 }
  0x13   : > { %s1230_s13 = sshll.u32 %s2455_s4, 3 }
  0x14   : > { %s1643_s16 = scalar_lea.vmem %s2366_s0, %s1230_s13 }
  0x16   : > { %vm323_vm0 = vcmask 0   ;;  %vm326_vm1 = vcmask 516096   ;;  %v1568_v1 = vmov -inf   ;;  %v1569_v2 = vmov 0.0  }
  0x17   : > { %324 = vst.msk [vmem:[#allocation2] sm:$0x1] %vm323_vm0, %v1568_v1 }
  0x18   : > { %325 = vst.msk [vmem:[#allocation3] sm:$0x1] %vm323_vm0, %v1569_v2 }
  0x19   : > { %327 = vst.msk [vmem:[#allocation4] sm:$0x1] %vm326_vm1, %v1569_v2 }
  0x1a PF: > { %v359_v3 = vld [vmem:[%s2367_s1 + $0x78] sm:$0xff]  ;;  %v357_v4 = vld [vmem:[%s2367_s1 + $0x68] sm:$0xff]  ;;  %v358_v6 = vld [vmem:[%s2367_s1 + $0x70] sm:$0xff]  ;;  %vm366_vm2 = vcmask 523264   ;;  %p1280_p5 = scmp.eq.s32.totalorder %s1635_s12, 2 }
  0x1b   : > { %488 = vmatpush.msra.mxu1 %v359_v3  ;;  %1307 = vmatpush.msra.mxu3 %v359_v3  ;;  %v355_v5 = vld [vmem:[%s2367_s1 + $0x58] sm:$0xff]  ;;  %v356_v7 = vld [vmem:[%s2367_s1 + $0x60] sm:$0xff]  ;;  %v353_v8 = vld [vmem:[%s2367_s1 + $0x48] sm:$0xff]  ;;  %s1293_s13 = scalar_lea.vmem (!%p1280_p5), [#allocation6], %s1566_s11 }
  0x1c   : > { %423 = vmatpush.msra.mxu0 %v358_v6  ;;  %1299 = vmatpush.msra.mxu2 %v358_v6  ;;  %v354_v9 = vld [vmem:[%s2367_s1 + $0x50] sm:$0xff]  ;;  %v351_v10 = vld [vmem:[%s2367_s1 + $0x38] sm:$0xff]  ;;  %v352_v11 = vld [vmem:[%s2367_s1 + $0x40] sm:$0xff] }
  0x1d   : > { %489 = vmatpush.msra.mxu1 %v357_v4  ;;  %1308 = vmatpush.msra.mxu3 %v357_v4  ;;  %v349_v12 = vld [vmem:[%s2367_s1 + $0x28] sm:$0xff]  ;;  %v350_v13 = vld [vmem:[%s2367_s1 + $0x30] sm:$0xff]  ;;  %v347_v14 = vld [vmem:[%s2367_s1 + $0x18] sm:$0xff] }
  0x1e   : > { %424 = vmatpush.msra.mxu0 %v356_v7  ;;  %1300 = vmatpush.msra.mxu2 %v356_v7  ;;  %v348_v15 = vld [vmem:[%s2367_s1 + $0x20] sm:$0xff]  ;;  %v345_v16 = vld [vmem:[%s2367_s1 + $0x8] sm:$0xff]  ;;  %v1692_v18 = vld [vmem:[%s1643_s16 + $0x50] sm:$0xff] }
  0x1f   : > { %490 = vmatpush.msra.mxu1 %v355_v5  ;;  %1309 = vmatpush.msra.mxu3 %v355_v5  ;;  %v1689_v17 = vld [vmem:[%s1643_s16] sm:$0xff]  ;;  %2390 = vst [vmem:[#allocation14_spill] sm:$0xff] %v1692_v18  ;;  %v346_v19 = vld [vmem:[%s2367_s1 + $0x10] sm:$0xff]  ;;  %v1709_v21 = vld [vmem:[%s1643_s16 + $0x8] sm:$0xff] }
  0x20   : > { %425 = vmatpush.msra.mxu0 %v354_v9  ;;  %1301 = vmatpush.msra.mxu2 %v354_v9  ;;  %2389 = vst [vmem:[#allocation13_spill] sm:$0xff] %v1689_v17  ;;  %v344_v20 = vld [vmem:[%s2367_s1] sm:$0xff]  ;;  %v1712_v22 = vld [vmem:[%s1643_s16 + $0x58] sm:$0xff]  ;;  %v1723_v23 = vld [vmem:[%s1643_s16 + $0x10] sm:$0xff] }
  0x21   : > { %491 = vmatpush.msra.mxu1 %v353_v8  ;;  %1310 = vmatpush.msra.mxu3 %v353_v8  ;;  %2391 = vst [vmem:[#allocation15_spill] sm:$0xff] %v1709_v21  ;;  %v1726_v24 = vld [vmem:[%s1643_s16 + $0x60] sm:$0xff]  ;;  %v1737_v25 = vld [vmem:[%s1643_s16 + $0x18] sm:$0xff]  ;;  %v1740_v26 = vld [vmem:[%s1643_s16 + $0x68] sm:$0xff] }
  0x22   : > { %426 = vmatpush.msra.mxu0 %v352_v11  ;;  %1302 = vmatpush.msra.mxu2 %v352_v11  ;;  %2392 = vst [vmem:[#allocation16_spill] sm:$0xff] %v1712_v22  ;;  %v1751_v27 = vld [vmem:[%s1643_s16 + $0x20] sm:$0xff]  ;;  %v1754_v28 = vld [vmem:[%s1643_s16 + $0x70] sm:$0xff]  ;;  %v1765_v29 = vld [vmem:[%s1643_s16 + $0x28] sm:$0xff] }
  0x23   : > { %492 = vmatpush.msra.mxu1 %v351_v10  ;;  %1311 = vmatpush.msra.mxu3 %v351_v10  ;;  %2393 = vst [vmem:[#allocation17_spill] sm:$0xff] %v1723_v23  ;;  %v1768_v30 = vld [vmem:[%s1643_s16 + $0x78] sm:$0xff]  ;;  %v1779_v31 = vld [vmem:[%s1643_s16 + $0x30] sm:$0xff]  ;;  %v1793_v33 = vld [vmem:[%s1643_s16 + $0x40] sm:$0xff] }
  0x24   : > { %427 = vmatpush.msra.mxu0 %v350_v13  ;;  %1303 = vmatpush.msra.mxu2 %v350_v13  ;;  %2394 = vst [vmem:[#allocation18_spill] sm:$0xff] %v1726_v24  ;;  %v1786_v32 = vld [vmem:[%s1643_s16 + $0x38] sm:$0xff]  ;;  %v1800_v34 = vld [vmem:[%s1643_s16 + $0x48] sm:$0xff]  ;;  %v360_v39 = vld [vmem:[%s2368_s2] sm:$0x3] }
  0x25   : > { %493 = vmatpush.msra.mxu1 %v349_v12  ;;  %1312 = vmatpush.msra.mxu3 %v349_v12  ;;  %2395 = vst [vmem:[#allocation19_spill] sm:$0xff] %v1737_v25  ;;  %v1809_v41 = vperm.slane %v360_v39, 1  ;;  %v1816_v58 = vperm.slane %v360_v39, 0 }
  0x26   : > { %428 = vmatpush.msra.mxu0 %v348_v15  ;;  %1304 = vmatpush.msra.mxu2 %v348_v15  ;;  %2396 = vst [vmem:[#allocation20_spill] sm:$0xff] %v1751_v27 }
  0x27   : > { %494 = vmatpush.msra.mxu1 %v347_v14  ;;  %1313 = vmatpush.msra.mxu3 %v347_v14  ;;  %2397 = vst [vmem:[#allocation21_spill] sm:$0xff] %v1765_v29 }
  0x28   : > { %429 = vmatpush.msra.mxu0 %v346_v19  ;;  %1305 = vmatpush.msra.mxu2 %v346_v19  ;;  %2398 = vst [vmem:[#allocation22_spill] sm:$0xff] %v1779_v31 }
  0x29   : > { %495 = vmatpush.msra.mxu1 %v345_v16  ;;  %1314 = vmatpush.msra.mxu3 %v345_v16  ;;  %2399 = vst [vmem:[#allocation23_spill] sm:$0xff] %v1786_v32 }
  0x2a   : > { %1248 = vmatmul.msk.f32.vlgmr.msra.gmra.mxu1 %vm366_vm2, %v1689_v17  ;;  %1258 = vmatmul.msk.f32.vlgmr.msra.gmra.mxu3 %vm366_vm2, %v1692_v18  ;;  %2400 = vst [vmem:[#allocation24_spill] sm:$0xff] %v1793_v33 }
  0x2b   : > { %430 = vmatpush.msra.mxu0 %v344_v20  ;;  %1306 = vmatpush.msra.mxu2 %v344_v20  ;;  %2401 = vst [vmem:[#allocation25_spill] sm:$0xff] %v1800_v34 }
  0x2c   : > { %1232 = vmatmul.msk.f32.vlgmr.msra.gmra.mxu0 %vm366_vm2, %v1689_v17  ;;  %1242 = vmatmul.msk.f32.vlgmr.msra.gmra.mxu2 %vm366_vm2, %v1692_v18 }
  0x32   : > { %1249 = vmatmul.msk.f32.gmra.mxu1 %vm366_vm2, %v1709_v21  ;;  %1259 = vmatmul.msk.f32.gmra.mxu3 %vm366_vm2, %v1712_v22 }
  0x34   : > { %1233 = vmatmul.msk.f32.gmra.mxu0 %vm366_vm2, %v1709_v21  ;;  %1243 = vmatmul.msk.f32.gmra.mxu2 %vm366_vm2, %v1712_v22 }
  0x3a   : > { %1250 = vmatmul.msk.f32.gmra.mxu1 %vm366_vm2, %v1723_v23  ;;  %1260 = vmatmul.msk.f32.gmra.mxu3 %vm366_vm2, %v1726_v24 }
  0x3c   : > { %1234 = vmatmul.msk.f32.gmra.mxu0 %vm366_vm2, %v1723_v23  ;;  %1244 = vmatmul.msk.f32.gmra.mxu2 %vm366_vm2, %v1726_v24 }
  0x42   : > { %1251 = vmatmul.msk.f32.gmra.mxu1 %vm366_vm2, %v1737_v25  ;;  %1261 = vmatmul.msk.f32.gmra.mxu3 %vm366_vm2, %v1740_v26 }
  0x44   : > { %1235 = vmatmul.msk.f32.gmra.mxu0 %vm366_vm2, %v1737_v25  ;;  %1245 = vmatmul.msk.f32.gmra.mxu2 %vm366_vm2, %v1740_v26 }
  0x4a   : > { %1252 = vmatmul.msk.f32.gmra.mxu1 %vm366_vm2, %v1751_v27  ;;  %1262 = vmatmul.msk.f32.gmra.mxu3 %vm366_vm2, %v1754_v28 }
  0x4c   : > { %1236 = vmatmul.msk.f32.gmra.mxu0 %vm366_vm2, %v1751_v27  ;;  %1246 = vmatmul.msk.f32.gmra.mxu2 %vm366_vm2, %v1754_v28 }
  0x52   : > { %1253 = vmatmul.msk.f32.gmra.mxu1 %vm366_vm2, %v1765_v29  ;;  %1263 = vmatmul.msk.f32.gmra.mxu3 %vm366_vm2, %v1768_v30 }
  0x54   : > { %1237 = vmatmul.msk.f32.gmra.mxu0 %vm366_vm2, %v1765_v29  ;;  %1247 = vmatmul.msk.f32.gmra.mxu2 %vm366_vm2, %v1768_v30 }
  0x5a   : > { %1254 = vmatmul.msk.f32.gmra.mxu1 %vm366_vm2, %v1779_v31 }
  0x5c   : > { %1238 = vmatmul.msk.f32.gmra.mxu0 %vm366_vm2, %v1779_v31 }
  0x62   : > { %1255 = vmatmul.msk.f32.gmra.mxu1 %vm366_vm2, %v1786_v32 }
  0x64   : > { %1239 = vmatmul.msk.f32.gmra.mxu0 %vm366_vm2, %v1786_v32 }
  0x6a   : > { %1256 = vmatmul.msk.f32.gmra.mxu1 %vm366_vm2, %v1793_v33 }
  0x6c   : > { %1240 = vmatmul.msk.f32.gmra.mxu0 %vm366_vm2, %v1793_v33 }
  0x72   : > { %1257 = vmatmul.msk.f32.gmra.mxu1 %vm366_vm2, %v1800_v34 }
  0x74   : > { %1241 = vmatmul.msk.f32.gmra.mxu0 %vm366_vm2, %v1800_v34 }
  0xa7   : > { %v497_v35 = vpop.f32.mrf.mxu1 }
  0xa8   : > { %v498_v46 = vadd.f32 %v497_v35, %v1809_v41 }
  0xa9   : > { %v432_v36 = vpop.f32.mrf.mxu0 }
  0xaa   : > { %v1264_v50 = vmul.f32 -1.442695, %v498_v46  ;;  %v433_v4 = vadd.f32 %v432_v36, %v1816_v58 }
  0xad   : > { %v527_v37 = vpop.f32.mrf.mxu3 }
  0xae   : > { %v528_v43 = vadd.f32 %v527_v37, %v1809_v41 }
  0xaf   : > { %v500_v38 = vpop.f32.mrf.mxu1  ;;  %v462_v40 = vpop.f32.mrf.mxu2 }
  0xb0   : > { %v1274_v47 = vmul.f32 -1.442695, %v528_v43  ;;  %v501_v56 = vadd.f32 %v500_v38, %v1809_v41  ;;  %v463_v10 = vadd.f32 %v462_v40, %v1816_v58 }
  0xb1   : > { %v435_v42 = vpop.f32.mrf.mxu0 }
  0xb2   : > { %1350 = vpow2.f32 %v1274_v47  ;;  %v1265_v61 = vmul.f32 -1.442695, %v501_v56  ;;  %v436_v35 = vadd.f32 %v435_v42, %v1816_v58 }
  0xb3   : > { %1352 = vpow2.f32 %v1264_v50 }
  0xb5   : > { %v530_v44 = vpop.f32.mrf.mxu3 }
  0xb6   : > { %v531_v48 = vadd.f32 %v530_v44, %v1809_v41 }
  0xb7   : > { %v503_v45 = vpop.f32.mrf.mxu1  ;;  %v465_v51 = vpop.f32.mrf.mxu2 }
  0xb8   : > { %v1275_v53 = vmul.f32 -1.442695, %v531_v48  ;;  %v1351_v57 = vpop.eup %1350  ;;  %v504_v3 = vadd.f32 %v503_v45, %v1809_v41  ;;  %v466_v47 = vadd.f32 %v465_v51, %v1816_v58 }
  0xb9   : > { %v438_v49 = vpop.f32.mrf.mxu0  ;;  %v1353_v63 = vpop.eup %1352  ;;  %v1820_v0 = vadd.f32 1.0, %v1351_v57 }
  0xba   : > { %1354 = vpow2.f32 %v1275_v53  ;;  %v1825_v8 = vadd.f32 1.0, %v1353_v63  ;;  %v1266_v11 = vmul.f32 -1.442695, %v504_v3  ;;  %v439_v48 = vadd.f32 %v438_v49, %v1816_v58 }
  0xbb   : > { %v784_v63 = vand.u32 2147483647, %v1820_v0  ;;  %vm780_vm3 = vweird.f32 %v1820_v0 }
  0xbd   : > { %v533_v52 = vpop.f32.mrf.mxu3  ;;  %vm1899_vm4 = vcmp.eq.f32.partialorder %v784_v63, 8.507059e+37 }
  0xbe   : > { %v534_v54 = vadd.f32 %v533_v52, %v1809_v41 }
  0xbf   : > { %v506_v55 = vpop.f32.mrf.mxu1  ;;  %v468_v2 = vpop.f32.mrf.mxu2 }
  0xc0   : > { %v1276_v59 = vmul.f32 -1.442695, %v534_v54  ;;  %v1355_v7 = vpop.eup %1354  ;;  %v507_v9 = vadd.f32 %v506_v55, %v1809_v41 }
  0xc1   : > { %v1818_v60 = vpop.f32.mrf.mxu0  ;;  %v1832_v13 = vadd.f32 1.0, %v1355_v7 }
  0xc2   : > { %1356 = vpow2.f32 %v1276_v59  ;;  %v1267_v15 = vmul.f32 -1.442695, %v507_v9 }
  0xc3   : > { %1358 = vpow2.f32 %v1265_v61  ;;  %vm795_vm6 = vweird.f32 %v1832_v13  ;;  %v799_v63 = vand.u32 2147483647, %v1832_v13 }
  0xc4   : > { %1360 = vrcp.f32 %v1820_v0 }
  0xc5   : > { %v536_v62 = vpop.f32.mrf.mxu3  ;;  %1362 = vtanh.f32 %v433_v4  ;;  %v469_v4 = vadd.f32 %v468_v2, %v1816_v58  ;;  %vm1983_vm11 = vcmp.eq.f32.partialorder %v799_v63, 8.507059e+37 }
  0xc6   : > { %v537_v1 = vadd.f32 %v536_v62, %v1809_v41 }
  0xc7   : > { %v509_v5 = vpop.f32.mrf.mxu1  ;;  %v471_v43 = vpop.f32.mrf.mxu2 }
  0xc8   : > { %v1277_v6 = vmul.f32 -1.442695, %v537_v1  ;;  %v1357_v14 = vpop.eup %1356  ;;  %v510_v39 = vadd.f32 %v509_v5, %v1809_v41 }
  0xc9   : > { %v1830_v12 = vpop.f32.mrf.mxu0  ;;  %v1359_v19 = vpop.eup %1358  ;;  %v1840_v38 = vadd.f32 1.0, %v1357_v14  ;;  %v442_v14 = vadd.f32 %v1818_v60, %v1816_v58  ;;  %v472_v60 = vadd.f32 %v471_v43, %v1816_v58 }
  0xca   : > { %1364 = vpow2.f32 %v1277_v6  ;;  %v1837_v37 = vpop.eup %1360  ;;  %v1845_v45 = vadd.f32 1.0, %v1359_v19  ;;  %v1268_v54 = vmul.f32 -1.442695, %v510_v39 }
  0xcb   : > { %1366 = vrcp.f32 %v1825_v8  ;;  %v1843_v44 = vpop.eup %1362  ;;  %v776_v52 = vmul.f32 %v1837_v37, %v1820_v0  ;;  %vm781_vm5 = vweird.f32 %v1837_v37  ;;  %vm810_vm13 = vweird.f32 %v1840_v38 }
  0xcc   : > { %1368 = vtanh.f32 %v463_v10  ;;  %vm1926_vm7 = vmor %vm780_vm3, %vm781_vm5 }
  0xcd   : > { %v539_v16 = vpop.f32.mrf.mxu3  ;;  %1370 = vpow2.f32 %v1266_v11  ;;  %v777_v62 = vsub.f32 1.0, %v776_v52 }
  0xce   : > { %v540_v20 = vadd.f32 %v539_v16, %v1809_v41  ;;  %1372 = vrcp.f32 %v1832_v13  ;;  %v786_v16 = vand.u32 2147483648, %v1820_v0 }
  0xcf   : > { %v512_v36 = vpop.f32.mrf.mxu1  ;;  %1374 = vpow2.f32 %v1267_v15  ;;  %v474_v15 = vpop.f32.mrf.mxu2 }
  0xd0   : > { %v1278_v40 = vmul.f32 -1.442695, %v540_v20  ;;  %v1365_v46 = vpop.eup %1364  ;;  %v513_v9 = vadd.f32 %v512_v36, %v1809_v41  ;;  %v787_v43 = vor.u32 1.1754944e-38, %v786_v16  ;;  %v475_v21 = vadd.f32 %v474_v15, %v1816_v58 }
  0xd1   : > { %v1848_v42 = vpop.eup %1366  ;;  %v1851_v50 = vpop.f32.mrf.mxu0  ;;  %v1859_v51 = vadd.f32 1.0, %v1365_v46 }
  0xd2   : > { %1376 = vpow2.f32 %v1278_v40  ;;  %v1855_v53 = vpop.eup %1368  ;;  %v1269_v46 = vmul.f32 -1.442695, %v513_v9 }
  0xd3   : > { %1378 = vtanh.f32 %v436_v35  ;;  %v1371_v55 = vpop.eup %1370  ;;  %v778_v35 = vmul.f32 %v1837_v37, %v777_v62  ;;  %vm825_vm12 = vweird.f32 %v1859_v51 }
  0xd4   : > { %1380 = vrcp.f32 %v1840_v38  ;;  %v1861_v57 = vpop.eup %1372  ;;  %v1865_v3 = vadd.f32 1.0, %v1371_v55 }
  0xd5   : > { %1382 = vrcp.f32 %v1845_v45  ;;  %v542_v56 = vpop.f32.mrf.mxu3  ;;  %v1375_v59 = vpop.eup %1374  ;;  %v791_v10 = vmul.f32 %v1861_v57, %v1832_v13  ;;  %vm796_vm8 = vweird.f32 %v1861_v57 }
  0xd6   : > { %1384 = vtanh.f32 %v466_v47  ;;  %v543_v49 = vadd.f32 %v542_v56, %v1809_v41  ;;  %v1884_v20 = vadd.f32 1.0, %v1375_v59  ;;  %v801_v59 = vand.u32 2147483648, %v1832_v13  ;;  %vm1979_vm10 = vmor %vm795_vm6, %vm796_vm8 }
  0xd7   : > { %1386 = vtanh.f32 %v439_v48  ;;  %v515_v61 = vpop.f32.mrf.mxu1  ;;  %v792_v48 = vsub.f32 1.0, %v791_v10 }
  0xd8   : > { %v1377_v1 = vpop.eup %1376  ;;  %1388 = vpow2.f32 %v1268_v54  ;;  %v1279_v5 = vmul.f32 -1.442695, %v543_v49  ;;  %v516_v2 = vadd.f32 %v515_v61, %v1809_v41  ;;  %v779_v61 = vadd.f32 %v1837_v37, %v778_v35 }
  0xd9   : > { %v1868_v6 = vpop.eup %1378  ;;  %1390 = vrcp.f32 %v1859_v51  ;;  %v1871_v7 = vadd.f32 1.0, %v1377_v1  ;;  %v1892_v39 = vpop.f32.mrf.mxu0  ;;  %v793_v10 = vmul.f32 %v1861_v57, %v792_v48  ;;  %v816_v35 = vand.u32 2147483648, %v1840_v38 }
  0xda   : > { %v1876_v11 = vpop.eup %1380  ;;  %1392 = vpow2.f32 %v1279_v5  ;;  %v1270_v54 = vmul.f32 -1.442695, %v516_v2  ;;  %v1935_v48 = vor.u32 1.1754944e-38, %v801_v59  ;;  %v831_v59 = vand.u32 2147483648, %v1859_v51 }
  0xdb   : > { %v1882_v19 = vpop.eup %1382  ;;  %1394 = vrcp.f32 %v1871_v7  ;;  %v806_v47 = vmul.f32 %v1876_v11, %v1840_v38  ;;  %vm811_vm9 = vweird.f32 %v1876_v11  ;;  %vm840_vm14 = vweird.f32 %v1871_v7 }
  0xdc   : > { %v1888_v36 = vpop.eup %1384  ;;  %1396 = vrcp.f32 %v1865_v3  ;;  %vm2057_vm8 = vmor %vm810_vm13, %vm811_vm9  ;;  %vm675_vm13 = vweird.f32 %v1884_v20 }
  0xdd   : > { %v1895_v40 = vpop.eup %1386  ;;  %1398 = vtanh.f32 %v469_v4  ;;  %v807_v9 = vsub.f32 1.0, %v806_v47 }
  0xde   : > { %v1389_v52 = vpop.eup %1388  ;;  %1400 = vtanh.f32 %v442_v14 }
  0xdf   : > { %v1903_v56 = vpop.eup %1390  ;;  %1402 = vrcp.f32 %v1884_v20  ;;  %v518_v49 = vpop.f32.mrf.mxu1  ;;  %v1942_v0 = vadd.f32 1.0, %v1389_v52  ;;  %v808_v23 = vmul.f32 %v1876_v11, %v807_v9 }
  0xe0   : > { %v1393_v62 = vpop.eup %1392  ;;  %1404 = vtanh.f32 %v472_v60  ;;  %v519_v1 = vadd.f32 %v518_v49, %v1809_v41  ;;  %v821_v47 = vmul.f32 %v1903_v56, %v1859_v51  ;;  %v1958_v60 = vor.u32 1.1754944e-38, %v816_v35 }
  0xe1   : > { %v1912_v4 = vpop.eup %1394  ;;  %1406 = vpow2.f32 %v1269_v46  ;;  %v1914_v5 = vadd.f32 1.0, %v1393_v62  ;;  %v477_v62 = vpop.f32.mrf.mxu2  ;;  %vm826_vm1 = vweird.f32 %v1903_v56 }
  0xe2   : > { %v1917_v14 = vpop.eup %1396  ;;  %1408 = vpow2.f32 %v1270_v54  ;;  %v1271_v2 = vmul.f32 -1.442695, %v519_v1  ;;  %v836_v16 = vmul.f32 %v1912_v4, %v1871_v7  ;;  %v783_v54 = vsel %vm1926_vm7, %v1837_v37, %v779_v61  ;;  %v1956_v52 = vpop.f32.mrf.mxu0  ;;  %vm2044_vm7 = vmor %vm825_vm12, %vm826_vm1 }
  0xe3   : > { %v1930_v46 = vpop.eup %1398  ;;  %1410 = vrcp.f32 %v1914_v5  ;;  %v1952_v37 = vadd.f32 %v1861_v57, %v793_v10  ;;  %v1962_v1 = vsel %vm1899_vm4, %v787_v43, %v783_v54  ;;  %v478_v9 = vadd.f32 %v477_v62, %v1816_v58 }
  0xe4   : > { %v1940_v49 = vpop.eup %1400  ;;  %1412 = vpow2.f32 %v1271_v2  ;;  %v837_v2 = vsub.f32 1.0, %v836_v16  ;;  %v822_v29 = vsub.f32 1.0, %v821_v47  ;;  %v1969_v31 = vmul.f32 %v1917_v14, %v1865_v3 }
  0xe5   : > { %v1946_v17 = vpop.eup %1402  ;;  %1414 = vrcp.f32 %v1942_v0  ;;  %v1991_v62 = vadd.f32 %v1876_v11, %v808_v23  ;;  %v798_v13 = vsel %vm1979_vm10, %v1861_v57, %v1952_v37  ;;  %v844_v37 = vand.u32 2147483647, %v1871_v7 }
  0xe6   : > { %v1954_v61 = vpop.eup %1404  ;;  %1416 = vtanh.f32 %v475_v21  ;;  %v838_v43 = vmul.f32 %v1912_v4, %v837_v2  ;;  %v671_v21 = vmul.f32 %v1946_v17, %v1884_v20  ;;  %v823_v32 = vmul.f32 %v1903_v56, %v822_v29 }
  0xe7   : > { %v1407_v25 = vpop.eup %1406  ;;  %v521_v27 = vpop.f32.mrf.mxu1  ;;  %1418 = vtanh.f32 %v478_v9  ;;  %v861_v2 = vand.u32 2147483648, %v1914_v5  ;;  %vm841_vm15 = vweird.f32 %v1912_v4  ;;  %v859_v29 = vand.u32 2147483647, %v1914_v5 }
  0xe8   : > { %v1409_v16 = vpop.eup %1408  ;;  %v522_v55 = vadd.f32 %v521_v27, %v1809_v41  ;;  %v1988_v27 = vor.u32 1.1754944e-38, %v831_v59  ;;  %v2002_v59 = vadd.f32 1.0, %v1407_v25  ;;  %v846_v25 = vand.u32 2147483648, %v1871_v7  ;;  %vm2028_vm4 = vmor %vm840_vm14, %vm841_vm15 }
  0xe9   : > { %v1411_v54 = vpop.eup %1410  ;;  %v2004_v23 = vadd.f32 1.0, %v1409_v16  ;;  %v672_v33 = vsub.f32 1.0, %v671_v21  ;;  %vm855_vm3 = vweird.f32 %v1914_v5  ;;  %v862_v21 = vor.u32 1.1754944e-38, %v861_v2 }
  0xea   : > { %v1413_v10 = vpop.eup %1412  ;;  %v1272_v15 = vmul.f32 -1.442695, %v522_v55  ;;  %v851_v63 = vmul.f32 %v1411_v54, %v1914_v5  ;;  %vm856_vm0 = vweird.f32 %v1411_v54  ;;  %v847_v22 = vor.u32 1.1754944e-38, %v846_v25 }
  0xeb   : > { %v2009_v55 = vadd.f32 1.0, %v1413_v10  ;;  %v2014_v35 = vpop.eup %1414  ;;  %v824_v10 = vadd.f32 %v1903_v56, %v823_v32  ;;  %vm857_vm5 = vmor %vm855_vm3, %vm856_vm0  ;;  %vm860_vm6 = vcmp.eq.f32.partialorder %v859_v29, 8.507059e+37  ;;  %vm845_vm10 = vcmp.eq.f32.partialorder %v844_v37, 8.507059e+37 }
  0xec   : > { %1420 = vpow2.f32 %v1272_v15  ;;  %v852_v57 = vsub.f32 1.0, %v851_v63  ;;  %v839_v15 = vadd.f32 %v1912_v4, %v838_v43  ;;  %v1417_v9 = vpop.eup %1416  ;;  %v2417_v37 = vand.u32 2147483647, %v1840_v38 }
  0xed   : > { %1422 = vrcp.f32 %v2004_v23  ;;  %v1419_v32 = vpop.eup %1418  ;;  %vm661_vm0 = vweird.f32 %v1917_v14  ;;  %vm660_vm1 = vweird.f32 %v1865_v3 }
  0xee   : > { %v853_v16 = vmul.f32 %v1411_v54, %v852_v57  ;;  %1424 = vrcp.f32 %v2002_v59  ;;  %v456_v57 = vpop.f32.mrf.mxu0  ;;  %v843_v7 = vsel %vm2028_vm4, %v1912_v4, %v839_v15  ;;  %v673_v4 = vmul.f32 %v1946_v17, %v672_v33  ;;  %vm662_vm3 = vmor %vm660_vm1, %vm661_vm0 }
  0xef   : > { %v524_v63 = vpop.f32.mrf.mxu1  ;;  %1426 = vrcp.f32 %v2009_v55  ;;  %vm815_vm12 = vcmp.eq.f32.partialorder %v2417_v37, 8.507059e+37 }
  0xf0   : > { %v525_v34 = vadd.f32 %v524_v63, %v1809_v41  ;;  %v854_v18 = vadd.f32 %v1411_v54, %v853_v16  ;;  %v803_v41 = vsel %vm1983_vm11, %v1935_v48, %v798_v13  ;;  %v2416_v13 = vand.u32 2147483647, %v1859_v51 }
  0xf1   : > { %vm676_vm11 = vweird.f32 %v1946_v17  ;;  %v674_v29 = vadd.f32 %v1946_v17, %v673_v4 }
  0xf2   : > { %v1421_v5 = vpop.eup %1420  ;;  %v1273_v16 = vmul.f32 -1.442695, %v525_v34  ;;  %v858_v63 = vsel %vm857_vm5, %v1411_v54, %v854_v18  ;;  %v828_v18 = vsel %vm2044_vm7, %v1903_v56, %v824_v10  ;;  %v813_v54 = vsel %vm2057_vm8, %v1876_v11, %v1991_v62  ;;  %vm677_vm15 = vmor %vm675_vm13, %vm676_vm11 }
  0xf3   : > { %v2048_v2 = vadd.f32 1.0, %v1421_v5  ;;  %v863_v47 = vsel %vm860_vm6, %v862_v21, %v858_v63  ;;  %v2066_v24 = vpop.eup %1422  ;;  %v848_v56 = vsel %vm845_vm10, %v847_v22, %v843_v7  ;;  %vm830_vm9 = vcmp.eq.f32.partialorder %v2416_v13, 8.507059e+37 }
  0xf4   : > { %1428 = vpow2.f32 %v1273_v16  ;;  %v880_v48 = vmul.f32 %v1419_v32, %v863_v47  ;;  %v2072_v25 = vpop.eup %1424  ;;  %v833_v33 = vsel %vm830_vm9, %v1988_v27, %v828_v18  ;;  %v2079_v11 = vmul.f32 %v1855_v53, %v1962_v1 }
  0xf5   : > { %1430 = vrcp.f32 %v2048_v2  ;;  %v2082_v22 = vpop.eup %1426  ;;  %v818_v51 = vsel %vm815_vm12, %v1958_v60, %v813_v54  ;;  %v2086_v62 = vmul.f32 %v1888_v36, %v803_v41  ;;  %v2418_v27 = vand.u32 2147483647, %v1884_v20 }
  0xf6   : > { %889 = vmatpush.xpose.msrb.mxu2 %v880_v48  ;;  %v879_v38 = vmul.f32 %v1417_v9, %v848_v56  ;;  %v716_v15 = vmul.f32 %v2066_v24, %v2004_v23  ;;  %v2419_v53 = vand.u32 2147483648, %v1884_v20  ;;  %v657_v10 = vsub.f32 1.0, %v1969_v31  ;;  %v459_v21 = vpop.f32.mrf.mxu0 }
  0xf7   : > { %vm680_vm14 = vcmp.eq.f32.partialorder %v2418_v27, 8.507059e+37  ;;  %v457_v60 = vadd.f32 %v456_v57, %v1816_v58  ;;  %v878_v36 = vmul.f32 %v1954_v61, %v833_v33  ;;  %v2100_v43 = vmul.f32 %v2072_v25, %v2002_v59 }
  0xf8   : > { %v682_v1 = vor.u32 1.1754944e-38, %v2419_v53  ;;  %v678_v32 = vsel %vm677_vm15, %v1946_v17, %v674_v29  ;;  %v731_v41 = vmul.f32 %v2082_v22, %v2009_v55  ;;  %v658_v5 = vmul.f32 %v1917_v14, %v657_v10 }
  0xf9   : > { %v664_v17 = vand.u32 2147483647, %v1865_v3  ;;  %v666_v16 = vand.u32 2147483648, %v1865_v3  ;;  %v717_v7 = vsub.f32 1.0, %v716_v15  ;;  %v2122_v18 = vadd.f32 %v1892_v39, %v1816_v58 }
  0xfa   : > { %v1429_v9 = vpop.eup %1428  ;;  %890 = vmatpush.xpose.msrb.mxu2 %v879_v38  ;;  %v683_v20 = vsel %vm680_vm14, %v682_v1, %v678_v32  ;;  %v659_v47 = vadd.f32 %v1917_v14, %v658_v5  ;;  %v460_v34 = vadd.f32 %v459_v21, %v1816_v58  ;;  %v732_v4 = vsub.f32 1.0, %v731_v41 }
  0xfb   : > { %v2107_v31 = vpop.eup %1430  ;;  %v2109_v61 = vadd.f32 1.0, %v1429_v9  ;;  %v2112_v57 = vmul.f32 %v1940_v49, %v683_v20  ;;  %v877_v49 = vmul.f32 %v1930_v46, %v818_v51  ;;  %v2129_v48 = vmul.f32 %v2014_v35, %v1942_v0 }
  0xfc   : > { %v746_v63 = vmul.f32 %v2107_v31, %v2048_v2  ;;  %v663_v54 = vsel %vm662_vm3, %v1917_v14, %v659_v47  ;;  %v667_v3 = vor.u32 1.1754944e-38, %v666_v16  ;;  %v2134_v39 = vadd.f32 %v1956_v52, %v1816_v58 }
  0xfd   : > { %1432 = vrcp.f32 %v2109_v61  ;;  %vm665_vm4 = vcmp.eq.f32.partialorder %v664_v17, 8.507059e+37  ;;  %v641_v46 = vmul.f32 %v1882_v19, %v1845_v45  ;;  %v2139_v13 = vmul.f32 %v2066_v24, %v717_v7 }
  0xfe   : > { %891 = vmatpush.xpose.msrb.mxu2 %v878_v36  ;;  %v747_v56 = vsub.f32 1.0, %v746_v63  ;;  %1434 = vtanh.f32 %v457_v60  ;;  %v702_v33 = vsub.f32 1.0, %v2100_v43  ;;  %v668_v37 = vsel %vm665_vm4, %v667_v3, %v663_v54 }
  0xff   : > { %1436 = vtanh.f32 %v460_v34  ;;  %vm750_vm5 = vweird.f32 %v2048_v2  ;;  %v2144_v14 = vmul.f32 %v1895_v40, %v668_v37  ;;  %v642_v52 = vsub.f32 1.0, %v641_v46 }
 0x100   : > { %vm751_vm6 = vweird.f32 %v2107_v31  ;;  %v733_v51 = vmul.f32 %v2082_v22, %v732_v4  ;;  %v651_v29 = vand.u32 2147483648, %v1845_v45  ;;  %v626_v27 = vmul.f32 %v1848_v42, %v1825_v8 }
 0x101   : > { %v748_v15 = vmul.f32 %v2107_v31, %v747_v56  ;;  %v643_v53 = vmul.f32 %v1882_v19, %v642_v52  ;;  %vm646_vm7 = vweird.f32 %v1882_v19  ;;  %v649_v40 = vand.u32 2147483647, %v1845_v45  ;;  %vm2182_vm0 = vmor %vm750_vm5, %vm751_vm6 }
 0x102   : > { %892 = vmatpush.xpose.msrb.mxu2 %v877_v49  ;;  %v769_v10 = vand.u32 2147483647, %v2109_v61  ;;  %v771_v60 = vand.u32 2147483648, %v2109_v61  ;;  %v627_v36 = vsub.f32 1.0, %v626_v27  ;;  %vm645_vm8 = vweird.f32 %v1845_v45 }
 0x103   : > { %v1433_v38 = vpop.eup %1432  ;;  %v644_v32 = vadd.f32 %v1882_v19, %v643_v53  ;;  %vm631_vm10 = vweird.f32 %v1848_v42  ;;  %v636_v9 = vand.u32 2147483648, %v1825_v8  ;;  %vm647_vm9 = vmor %vm645_vm8, %vm646_vm7  ;;  %v652_v20 = vor.u32 1.1754944e-38, %v651_v29 }
 0x104   : > { %v761_v1 = vmul.f32 %v1433_v38, %v2109_v61  ;;  %v1435_v21 = vpop.eup %1434  ;;  %v628_v5 = vmul.f32 %v1848_v42, %v627_v36  ;;  %v634_v17 = vand.u32 2147483647, %v1825_v8  ;;  %v749_v63 = vadd.f32 %v2107_v31, %v748_v15 }
 0x105   : > { %v1437_v16 = vpop.eup %1436  ;;  %v648_v7 = vsel %vm647_vm9, %v1882_v19, %v644_v32  ;;  %vm650_vm11 = vcmp.eq.f32.partialorder %v649_v40, 8.507059e+37  ;;  %vm630_vm12 = vweird.f32 %v1825_v8  ;;  %vm766_vm13 = vweird.f32 %v1433_v38 }
 0x106   : > { %893 = vmatpush.xpose.msrb.mxu2 %v2086_v62  ;;  %v762_v41 = vsub.f32 1.0, %v761_v1  ;;  %v653_v47 = vsel %vm650_vm11, %v652_v20, %v648_v7  ;;  %v629_v62 = vadd.f32 %v1848_v42, %v628_v5  ;;  %v754_v49 = vand.u32 2147483647, %v2048_v2  ;;  %vm632_vm14 = vmor %vm630_vm12, %vm631_vm10 }
 0x107   : > { %v756_v34 = vand.u32 2147483648, %v2048_v2  ;;  %v2172_v4 = vmul.f32 %v1868_v6, %v653_v47  ;;  %v637_v54 = vor.u32 1.1754944e-38, %v636_v9  ;;  %vm765_vm15 = vweird.f32 %v2109_v61 }
 0x108   : > { %v763_v45 = vmul.f32 %v1433_v38, %v762_v41  ;;  %v633_v6 = vsel %vm632_vm14, %v1848_v42, %v629_v62  ;;  %vm635_vm1 = vcmp.eq.f32.partialorder %v634_v17, 8.507059e+37  ;;  %vm767_vm3 = vmor %vm765_vm15, %vm766_vm13  ;;  %v772_v3 = vor.u32 1.1754944e-38, %v771_v60  ;;  %v882_v41 = vld [vmem:[#allocation5] sm:$0x1] }
 0x109   : > { %v734_v56 = vadd.f32 %v2082_v22, %v733_v51  ;;  %vm736_vm4 = vweird.f32 %v2082_v22  ;;  %vm770_vm7 = vcmp.eq.f32.partialorder %v769_v10, 8.507059e+37  ;;  %v753_v2 = vsel %vm2182_vm0, %v2107_v31, %v749_v63 }
 0x10a   : > { %894 = vmatpush.xpose.msrb.mxu2 %v2079_v11  ;;  %v764_v19 = vadd.f32 %v1433_v38, %v763_v45  ;;  %v638_v11 = vsel %vm635_vm1, %v637_v54, %v633_v6  ;;  %1438 = vtanh.f32 %v2134_v39  ;;  %v757_v37 = vor.u32 1.1754944e-38, %v756_v34 }
 0x10b   : > { %v2193_v61 = vmul.f32 %v1843_v44, %v638_v11  ;;  %v741_v52 = vand.u32 2147483648, %v2009_v55  ;;  %vm755_vm5 = vcmp.eq.f32.partialorder %v754_v49, 8.507059e+37  ;;  %vm735_vm6 = vweird.f32 %v2009_v55 }
 0x10c   : > { %v768_v46 = vsel %vm767_vm3, %v1433_v38, %v764_v19  ;;  %v739_v51 = vand.u32 2147483647, %v2009_v55  ;;  %v758_v27 = vsel %vm755_vm5, %v757_v37, %v753_v2  ;;  %vm2201_vm8 = vmor %vm735_vm6, %vm736_vm4  ;;  %v687_v44 = vsub.f32 1.0, %v2129_v48 }
 0x10d   : > { %v773_v42 = vsel %vm770_vm7, %v772_v3, %v768_v46  ;;  %v738_v39 = vsel %vm2201_vm8, %v2082_v22, %v734_v56  ;;  %v719_v38 = vadd.f32 %v2066_v24, %v2139_v13  ;;  %vm721_vm10 = vweird.f32 %v2066_v24 }
 0x10e   : > { %v874_v29 = vmul.f32 %v1437_v16, %v773_v42  ;;  %v703_v55 = vmul.f32 %v2072_v25, %v702_v33  ;;  %v448_v15 = vadd.f32 %v1851_v50, %v1816_v58  ;;  %1440 = vtanh.f32 %v2122_v18 }
 0x10f   : > { %v742_v48 = vor.u32 1.1754944e-38, %v741_v52  ;;  %v726_v53 = vand.u32 2147483648, %v2004_v23  ;;  %v873_v40 = vmul.f32 %v1435_v21, %v758_v27  ;;  %vm740_vm9 = vcmp.eq.f32.partialorder %v739_v51, 8.507059e+37 }
 0x110   : > { %895 = vmatpush.xpose.msrb.mxu2 %v874_v29  ;;  %vm720_vm11 = vweird.f32 %v2004_v23  ;;  %v724_v22 = vand.u32 2147483647, %v2004_v23  ;;  %v1439_v13 = vpop.eup %1438  ;;  %v704_v18 = vadd.f32 %v2072_v25, %v703_v55  ;;  %vm706_vm13 = vweird.f32 %v2072_v25 }
 0x111   : > { %v743_v1 = vsel %vm740_vm9, %v742_v48, %v738_v39  ;;  %vm2221_vm12 = vmor %vm720_vm11, %vm721_vm10  ;;  %v688_v33 = vmul.f32 %v2014_v35, %v687_v44  ;;  %v445_v23 = vadd.f32 %v1830_v12, %v1816_v58  ;;  %1442 = vtanh.f32 %v448_v15 }
 0x112   : > { %v723_v50 = vsel %vm2221_vm12, %v2066_v24, %v719_v38  ;;  %v727_v10 = vor.u32 1.1754944e-38, %v726_v53  ;;  %v711_v60 = vand.u32 2147483648, %v2002_v59  ;;  %v872_v36 = vmul.f32 %v1439_v13, %v743_v1 }
 0x113   : > { %vm725_vm14 = vcmp.eq.f32.partialorder %v724_v22, 8.507059e+37  ;;  %vm705_vm15 = vweird.f32 %v2002_v59  ;;  %v709_v32 = vand.u32 2147483647, %v2002_v59  ;;  %v689_v12 = vadd.f32 %v2014_v35, %v688_v33 }
 0x114   : > { %896 = vmatpush.xpose.msrb.mxu2 %v873_v40  ;;  %v1441_v24 = vpop.eup %1440  ;;  %v728_v9 = vsel %vm725_vm14, %v727_v10, %v723_v50  ;;  %vm2236_vm0 = vmor %vm705_vm15, %vm706_vm13  ;;  %vm691_vm1 = vweird.f32 %v2014_v35  ;;  %v1570_v20 = vmov 0   ;;  %1444 = vtanh.f32 %v445_v23 }
 0x115   : > { %v708_v58 = vsel %vm2236_vm0, %v2072_v25, %v704_v18  ;;  %1349 = vset.pattern.permute.xlu0 %v1570_v20  ;;  %v712_v59 = vor.u32 1.1754944e-38, %v711_v60  ;;  %v696_v5 = vand.u32 2147483648, %v1942_v0  ;;  %v871_v17 = vmul.f32 %v1441_v24, %v728_v9 }
 0x116   : > { %885 = vperm.xlu0 %1349, %v882_v41   ;;  %vm710_vm3 = vcmp.eq.f32.partialorder %v709_v32, 8.507059e+37  ;;  %vm690_vm4 = vweird.f32 %v1942_v0  ;;  %v694_v16 = vand.u32 2147483647, %v1942_v0  ;;  %v881_v0 = vld [vmem:[%s2369_s3] sm:$0x1] }
 0x117   : > { %v1443_v63 = vpop.eup %1442  ;;  %v713_v7 = vsel %vm710_vm3, %v712_v59, %v708_v58  ;;  %vm692_vm7 = vmor %vm690_vm4, %vm691_vm1  ;;  %v697_v45 = vor.u32 1.1754944e-38, %v696_v5 }
 0x118   : > { %897 = vmatpush.xpose.msrb.mxu2 %v872_v36  ;;  %v693_v25 = vsel %vm692_vm7, %v2014_v35, %v689_v12  ;;  %v870_v47 = vmul.f32 %v1443_v63, %v713_v7  ;;  %vm695_vm5 = vcmp.eq.f32.partialorder %v694_v16, 8.507059e+37 }
 0x119   : > { %v698_v49 = vsel %vm695_vm5, %v697_v45, %v693_v25 }
 0x11a   : > { %v1445_v62 = vpop.eup %1444 }
 0x11b   : > { %v869_v34 = vmul.f32 %v1445_v62, %v698_v49 }
 0x11c   : > { %898 = vmatpush.xpose.msrb.mxu2 %v871_v17 }
 0x120   : > { %899 = vmatpush.xpose.msrb.mxu2 %v870_v47 }
 0x124   : > { %900 = vmatpush.xpose.msrb.mxu2 %v869_v34 }
 0x128   : > { %901 = vmatpush.xpose.msrb.mxu2 %v2112_v57 }
 0x12c   : > { %902 = vmatpush.xpose.msrb.mxu2 %v2144_v14 }
 0x130   : > { %903 = vmatpush.xpose.msrb.mxu2 %v2172_v4 }
 0x134   : > { %904 = vmatpush.xpose.msrb.mxu2 %v2193_v61 }
 0x137   : > { %905 = vmatmul.f32.vlgmr.msrb.gmra.mxu2 %v881_v0 }
 0x188   : > { %v886_v35 = vpop.permute.xlu0 %885 }
 0x189   : > { %v888_v54 = vperm.slane %v886_v35, 0 }
 0x1b7   : > { %912 = sbr.rel (%p1280_p5) target bundleno = 821 (0x335), region = 56 }
 0x1ba   : > { %v906_v19 = vpop.f32.mrf.mxu2 }
 0x1bb   : > { %v2256_v8 = vadd.f32 %v906_v19, %v888_v54 }
 0x1bc   : > { %vm916_vm6 = vcmask 1040384   ;;  %949 = vmatpush.msra.mxu0 %v1768_v30  ;;  %v2428_v14 = vld [vmem:[#allocation18_spill] sm:$0xff]  ;;  %v2429_v4 = vld [vmem:[#allocation16_spill] sm:$0xff]  ;;  %v2431_v3 = vld [vmem:[#allocation25_spill] sm:$0xff]  ;;  %v1571_v51 = vmov 0   ;;  %vm939_vm8 = vcmask 0  }
 0x1bd   : > { %v917_v57 = vsel %vm916_vm6, %v2256_v8, -inf  ;;  %1295 = vst [vmem:[%s1293_s13 - $0x1] sm:$0x1] %v2256_v8  ;;  %v2430_v6 = vld [vmem:[#allocation14_spill] sm:$0xff]  ;;  %v2432_v56 = vld [vmem:[#allocation24_spill] sm:$0xff]  ;;  %v2433_v11 = vld [vmem:[#allocation23_spill] sm:$0xff]  ;;  %1446 = vset.pattern.permute.xlu0 %v1571_v51  ;;  %1447 = vset.pattern.permute.xlu1 %v1571_v51 }
 0x1be   : > { %918 = vmax.xlane.f32.xlu0 %v917_v57  ;;  %950 = vmatpush.msra.mxu0 %v1754_v28  ;;  %v2434_v46 = vld [vmem:[#allocation22_spill] sm:$0xff]  ;;  %v2435_v2 = vld [vmem:[#allocation21_spill] sm:$0xff]  ;;  %v2436_v61 = vld [vmem:[#allocation20_spill] sm:$0xff]  ;;  %vm970_vm10 = vcmask 516096  }
 0x1bf   : > { %v2437_v42 = vld [vmem:[#allocation19_spill] sm:$0xff]  ;;  %v2438_v37 = vld [vmem:[#allocation17_spill] sm:$0xff] }
 0x1c0   : > { %951 = vmatpush.msra.mxu0 %v1740_v26  ;;  %v2439_v52 = vld [vmem:[#allocation15_spill] sm:$0xff]  ;;  %v2440_v29 = vld [vmem:[#allocation13_spill] sm:$0xff] }
 0x1c1   : > { %v915_v27 = vld [vmem:[#allocation2] sm:$0x1]  ;;  %v933_v43 = vld [vmem:[#allocation3] sm:$0x1]  ;;  %v941_v10 = vld [vmem:[#allocation4] sm:$0x1] }
 0x1c2   : > { %952 = vmatpush.msra.mxu0 %v2428_v14 }
 0x1c4   : > { %953 = vmatpush.msra.mxu0 %v2429_v4 }
 0x1c6   : > { %954 = vmatpush.msra.mxu0 %v2430_v6 }
 0x1c8   : > { %955 = vmatpush.msra.mxu0 %v2431_v3 }
 0x1ca   : > { %956 = vmatpush.msra.mxu0 %v2432_v56 }
 0x1cc   : > { %957 = vmatpush.msra.mxu0 %v2433_v11 }
 0x1ce   : > { %958 = vmatpush.msra.mxu0 %v2434_v46 }
 0x1d0   : > { %959 = vmatpush.msra.mxu0 %v2435_v2 }
 0x1d2   : > { %960 = vmatpush.msra.mxu0 %v2436_v61 }
 0x1d4   : > { %961 = vmatpush.msra.mxu0 %v2437_v42 }
 0x1d6   : > { %962 = vmatpush.msra.mxu0 %v2438_v37 }
 0x1d8   : > { %963 = vmatpush.msra.mxu0 %v2439_v52 }
 0x1da   : > { %964 = vmatpush.msra.mxu0 %v2440_v29 }
 0x231   : > { %v919_v31 = vpop.xlane.xlu0 %918 }
 0x232   : > { %v920_v44 = vmax.f32 %v915_v27, %v919_v31 }
 0x234   : > { %v921_v39 = vsub.f32 %v915_v27, %v920_v44  ;;  %972 = vst.msk [vmem:[#allocation2] sm:$0x1] %vm939_vm8, %v920_v44  ;;  %926 = vperm.xlu0 %1446, %v920_v44  }
 0x236   : > { %v922_v38 = vmul.f32 1.442695, %v921_v39 }
 0x238   : > { %1448 = vpow2.f32 %v922_v38 }
 0x23e   : > { %v1449_v55 = vpop.eup %1448 }
 0x23f   : > { %944 = vperm.xlu1 %1447, %v1449_v55   ;;  %v934_v50 = vmul.f32 %v1449_v55, %v933_v43 }
 0x2a6   : > { %v927_v15 = vpop.permute.xlu0 %926 }
 0x2a7   : > { %v929_v48 = vperm.slane %v927_v15, 0 }
 0x2a9   : > { %v930_v53 = vsub.f32 %v2256_v8, %v929_v48 }
 0x2ab   : > { %v931_v40 = vmul.f32 1.442695, %v930_v53 }
 0x2ad   : > { %1450 = vpow2.f32 %v931_v40 }
 0x2b1   : > { %v945_v1 = vpop.permute.xlu1 %944 }
 0x2b2   : > { %v947_v23 = vperm.slane %v945_v1, 0 }
 0x2b3   : > { %v1451_v22 = vpop.eup %1450 }
 0x2b4   : > { %965 = vmatmul.f32.vlgmr.msra.gmra.mxu0 %v1451_v22  ;;  %v935_v13 = vsel %vm916_vm6, %v1451_v22, 0.0  ;;  %v948_v60 = vmul.f32 %v947_v23, %v941_v10 }
 0x2b5   : > { %936 = vadd.xlane.f32.xlu1 %v935_v13 }
 0x328   : > { %v937_v18 = vpop.xlane.xlu1 %936 }
 0x329   : > { %v938_v33 = vadd.f32 %v937_v18, %v934_v50 }
 0x32b   : > { %940 = vst.msk [vmem:[#allocation3] sm:$0x1] %vm939_vm8, %v938_v33 }
 0x331   : > { %v966_v36 = vpop.f32.mrf.mxu0 }
 0x332   : > { %v969_v32 = vadd.f32 %v966_v36, %v948_v60 }
 0x334   : > { %971 = vst.msk [vmem:[#allocation4] sm:$0x1] %vm970_vm10, %v969_v32 }
 0x335 PF: > { %p1282_p6 = scmp.ne.s32.totalorder %s1635_s12, 2 }
 0x336   : > { %s1296_s14 = scalar_lea.vmem (!%p1282_p6), [#allocation6], %s1566_s11 }
 0x337   : > { %976 = sbr.rel (%p1282_p6) target bundleno = 1703 (0x6a7), region = 60 }
 0x33c   : > { %v977_v24 = vlaneseq  ;;  %1017 = vmatpush.msra.mxu0 %v1768_v30  ;;  %vm984_vm9 = vcmask 1040384   ;;  %v2441_v58 = vld [vmem:[#allocation18_spill] sm:$0xff]  ;;  %v2442_v12 = vld [vmem:[#allocation16_spill] sm:$0xff]  ;;  %v2444_v30 = vld [vmem:[#allocation25_spill] sm:$0xff]  ;;  %v1572_v45 = vmov 0   ;;  %vm1007_vm12 = vcmask 0  }
 0x33d   : > { %v2443_v20 = vld [vmem:[#allocation14_spill] sm:$0xff]  ;;  %v2446_v59 = vld [vmem:[#allocation23_spill] sm:$0xff]  ;;  %v2448_v5 = vld [vmem:[#allocation21_spill] sm:$0xff]  ;;  %1452 = vset.pattern.permute.xlu0 %v1572_v45  ;;  %1453 = vset.pattern.permute.xlu1 %v1572_v45  ;;  %vm1038_vm13 = vcmask 516096   ;;  %vm1101_vm14 = vcmask 8192  }
 0x33e   : > { %v978_v9 = vand.u32 127, %v977_v24  ;;  %1018 = vmatpush.msra.mxu0 %v1754_v28  ;;  %v2445_v28 = vld [vmem:[#allocation24_spill] sm:$0xff]  ;;  %v2450_v16 = vld [vmem:[#allocation19_spill] sm:$0xff]  ;;  %v2451_v63 = vld [vmem:[#allocation17_spill] sm:$0xff]  ;;  %1454 = vset.pattern.permute.xlu2 %v1572_v45 }
 0x33f   : > { %v2449_v17 = vld [vmem:[#allocation20_spill] sm:$0xff]  ;;  %v2452_v7 = vld [vmem:[#allocation15_spill] sm:$0xff]  ;;  %v2453_v25 = vld [vmem:[#allocation13_spill] sm:$0xff] }
 0x340   : > { %vm979_vm11 = vcmp.lt.s32.totalorder %v978_v9, 44  ;;  %1019 = vmatpush.msra.mxu0 %v1740_v26  ;;  %v2447_v26 = vld [vmem:[#allocation22_spill] sm:$0xff]  ;;  %v983_v47 = vld [vmem:[#allocation2] sm:$0x1]  ;;  %v1001_v3 = vld [vmem:[#allocation3] sm:$0x1] }
 0x341   : > { %v980_v21 = vsel %vm979_vm11, %v2256_v8, -inf  ;;  %v1076_v11 = vld [vmem:[%s2371_s5 + $0x38] sm:$0xff]  ;;  %v1075_v46 = vld [vmem:[%s2371_s5 + $0x30] sm:$0xff]  ;;  %v1074_v42 = vld [vmem:[%s2371_s5 + $0x28] sm:$0xff] }
 0x342   : > { %v985_v41 = vsel %vm984_vm9, %v980_v21, -inf  ;;  %1298 = vst [vmem:[%s1296_s14 - $0x1] sm:$0x1] %v980_v21  ;;  %1020 = vmatpush.msra.mxu0 %v2441_v58  ;;  %1089 = vmatpush.msra.mxu1 %v1076_v11  ;;  %v1073_v37 = vld [vmem:[%s2371_s5 + $0x20] sm:$0xff]  ;;  %v1072_v52 = vld [vmem:[%s2371_s5 + $0x18] sm:$0xff]  ;;  %v1071_v29 = vld [vmem:[%s2371_s5 + $0x10] sm:$0xff] }
 0x343   : > { %986 = vmax.xlane.f32.xlu0 %v985_v41  ;;  %v1009_v31 = vld [vmem:[#allocation4] sm:$0x1]  ;;  %v1070_v48 = vld [vmem:[%s2371_s5 + $0x8] sm:$0xff]  ;;  %v1077_v43 = vld [vmem:[%s2372_s6] sm:$0x1] }
 0x344   : > { %1021 = vmatpush.msra.mxu0 %v2442_v12  ;;  %1090 = vmatpush.msra.mxu1 %v1075_v46  ;;  %v1069_v53 = vld [vmem:[%s2371_s5] sm:$0xff] }
 0x346   : > { %1022 = vmatpush.msra.mxu0 %v2443_v20  ;;  %1091 = vmatpush.msra.mxu1 %v1074_v42 }
 0x348   : > { %1023 = vmatpush.msra.mxu0 %v2444_v30  ;;  %1092 = vmatpush.msra.mxu1 %v1073_v37 }
 0x349   : > { %v1043_v60 = vld [vmem:[#allocation6] sm:$0x7] }
 0x34a   : > { %1024 = vmatpush.msra.mxu0 %v2445_v28  ;;  %1093 = vmatpush.msra.mxu1 %v1072_v52 }
 0x34c   : > { %1025 = vmatpush.msra.mxu0 %v2446_v59  ;;  %1094 = vmatpush.msra.mxu1 %v1071_v29 }
 0x34e   : > { %1026 = vmatpush.msra.mxu0 %v2447_v26  ;;  %1095 = vmatpush.msra.mxu1 %v1070_v48 }
 0x350   : > { %1027 = vmatpush.msra.mxu0 %v2448_v5  ;;  %1096 = vmatpush.msra.mxu1 %v1069_v53 }
 0x352   : > { %1028 = vmatpush.msra.mxu0 %v2449_v17 }
 0x354   : > { %1029 = vmatpush.msra.mxu0 %v2450_v16 }
 0x356   : > { %1030 = vmatpush.msra.mxu0 %v2451_v63 }
 0x358   : > { %1031 = vmatpush.msra.mxu0 %v2452_v7 }
 0x35a   : > { %1032 = vmatpush.msra.mxu0 %v2453_v25 }
 0x3b6   : > { %v987_v62 = vpop.xlane.xlu0 %986 }
 0x3b7   : > { %v988_v49 = vmax.f32 %v983_v47, %v987_v62 }
 0x3b9   : > { %v989_v34 = vsub.f32 %v983_v47, %v988_v49  ;;  %1040 = vst.msk [vmem:[#allocation2] sm:$0x1] %vm1007_vm12, %v988_v49  ;;  %994 = vperm.xlu0 %1452, %v988_v49  }
 0x3bb   : > { %v990_v4 = vmul.f32 1.442695, %v989_v34 }
 0x3c0   : > { %v1455_v0 = vld [vmem:[#allocation2] ss:$0 sm:$0xff] }
 0x3c1   : > { %1048 = vperm.xlu0 %1452, %v1455_v0  }
 0x42b   : > { %v995_v35 = vpop.permute.xlu0 %994 }
 0x42c   : > { %v997_v54 = vperm.slane %v995_v35, 0 }
 0x42e   : > { %v998_v19 = vsub.f32 %v980_v21, %v997_v54 }
 0x430   : > { %v999_v8 = vmul.f32 1.442695, %v998_v19 }
 0x432   : > { %1456 = vpow2.f32 %v999_v8 }
 0x433   : > { %1458 = vpow2.f32 %v990_v4  ;;  %v1049_v10 = vpop.permute.xlu0 %1048 }
 0x434   : > { %v1051_v36 = vsub.f32 %v1043_v60, %v1049_v10 }
 0x436   : > { %v1052_v32 = vmul.f32 1.442695, %v1051_v36 }
 0x438   : > { %v1457_v57 = vpop.eup %1456 }
 0x439   : > { %1033 = vmatmul.f32.vlgmr.msra.gmra.mxu0 %v1457_v57  ;;  %v1003_v14 = vsel %vm984_vm9, %v1457_v57, 0.0  ;;  %v1459_v6 = vpop.eup %1458 }
 0x43a   : > { %1004 = vadd.xlane.f32.xlu1 %v1003_v14  ;;  %v1002_v56 = vmul.f32 %v1459_v6, %v1001_v3 }
 0x453   : > { %1012 = vperm.xlu1 %1453, %v1459_v6  }
 0x4ad   : > { %v1005_v2 = vpop.xlane.xlu1 %1004 }
 0x4ae   : > { %v1006_v61 = vadd.f32 %v1005_v2, %v1002_v56 }
 0x4b0   : > { %1008 = vst.msk [vmem:[#allocation3] sm:$0x1] %vm1007_vm12, %v1006_v61 }
 0x4b6   : > { %v1034_v55 = vpop.f32.mrf.mxu0 }
 0x4b7   : > { %v1041_v51 = vld [vmem:[#allocation3] sm:$0x1] }
 0x4b8   : > { %1460 = vrcp.f32 %v1041_v51 }
 0x4b9   : > { %1462 = vpow2.f32 %v1052_v32 }
 0x4be   : > { %v1461_v27 = vpop.eup %1460 }
 0x4bf   : > { %1064 = vperm.xlu2 %1454, %v1461_v27   ;;  %v1055_v23 = vperm.slane %v1461_v27, 0  ;;  %v1463_v41 = vpop.eup %1462 }
 0x4c5   : > { %v1013_v44 = vpop.permute.xlu1 %1012 }
 0x4c6   : > { %v1015_v39 = vperm.slane %v1013_v44, 0 }
 0x4c8   : > { %v1016_v38 = vmul.f32 %v1015_v39, %v1009_v31 }
 0x4ca   : > { %v1037_v15 = vadd.f32 %v1034_v55, %v1016_v38 }
 0x4cc   : > { %1039 = vst.msk [vmem:[#allocation4] sm:$0x1] %vm1038_vm13, %v1037_v15 }
 0x4d3   : > { %v1062_v13 = vld [vmem:[#allocation4] sm:$0x1] }
 0x519   : > { %v1065_v40 = vpop.permute.xlu2 %1064 }
 0x51a   : > { %v1067_v22 = vperm.slane %v1065_v40, 0 }
 0x51c   : > { %v1068_v1 = vmul.f32 %v1067_v22, %v1062_v13 }
 0x51e   : > { %1284 = vmatmul.msk.f32.vlgmr.msra.gmra.mxu1 %vm366_vm2, %v1068_v1 }
 0x59b   : > { %v1098_v50 = vpop.f32.mrf.mxu1 }
 0x59c   : > { %v1099_v18 = vadd.f32 %v1098_v50, %v1077_v43 }
 0x59e   : > { %v1103_v33 = vsel %vm1101_vm14, %v1099_v18, -inf  ;;  %1102 = vst.msk [vmem:[#allocation8] sm:$0x1] %vm1101_vm14, %v1099_v18 }
 0x59f   : > { %1104 = vmax.xlane.f32.xlu2 %v1103_v33 }
 0x5b7   : > { %1057 = vperm.xlu2 %1454, %v1055_v23  }
 0x612   : > { %v1105_v24 = vpop.xlane.xlu2 %1104 }
 0x613   : > { %v1106_v9 = vsub.f32 %v1099_v18, %v1105_v24 }
 0x615   : > { %v1107_v21 = vmul.f32 1.442695, %v1106_v9 }
 0x617   : > { %1464 = vpow2.f32 %v1107_v21 }
 0x61a   : > { %v1058_v58 = vpop.permute.xlu2 %1057 }
 0x61b   : > { %v1060_v12 = vmul.f32 %v1463_v41, %v1058_v58 }
 0x61d   : > { %v1465_v20 = vpop.eup %1464  ;;  %1061 = vst [vmem:[#allocation6] sm:$0x7] %v1060_v12 }
 0x61e   : > { %v1109_v30 = vsel %vm1101_vm14, %v1465_v20, 0.0 }
 0x61f   : > { %1110 = vadd.xlane.f32.xlu1 %v1109_v30 }
 0x692   : > { %v1111_v28 = vpop.xlane.xlu1 %1110 }
 0x693   : > { %1466 = vrcp.f32 %v1111_v28  ;;  %v1123_v17 = vand.u32 2147483648, %v1111_v28  ;;  %v1121_v63 = vand.u32 2147483647, %v1111_v28  ;;  %vm1117_vm15 = vweird.f32 %v1111_v28 }
 0x695   : > { %v1124_v25 = vor.u32 1.1754944e-38, %v1123_v17  ;;  %vm1122_vm1 = vcmp.eq.f32.partialorder %v1121_v63, 8.507059e+37 }
 0x699   : > { %v1467_v59 = vpop.eup %1466 }
 0x69a   : > { %v1113_v26 = vmul.f32 %v1467_v59, %v1111_v28  ;;  %vm1118_vm2 = vweird.f32 %v1467_v59 }
 0x69b   : > { %vm1119_vm0 = vmor %vm1117_vm15, %vm1118_vm2 }
 0x69c   : > { %v1114_v5 = vsub.f32 1.0, %v1113_v26 }
 0x69e   : > { %v1115_v16 = vmul.f32 %v1467_v59, %v1114_v5 }
 0x6a0   : > { %v1116_v7 = vadd.f32 %v1467_v59, %v1115_v16 }
 0x6a2   : > { %v1120_v45 = vsel %vm1119_vm0, %v1467_v59, %v1116_v7 }
 0x6a3   : > { %v1125_v47 = vsel %vm1122_vm1, %v1124_v25, %v1120_v45 }
 0x6a4   : > { %v1126_v62 = vmul.f32 %v1465_v20, %v1125_v47 }
 0x6a6   : > { %1127 = vst.msk [vmem:[#allocation10] sm:$0x1] %vm1101_vm14, %v1126_v62 }
 0x6a7 PF: > { %s1148_s15 = sshll.u32 %s2374_s8, 4  ;;  %s1573_s17 = smov [#allocation8]   ;;  %s1149_s15 = int_to_ptr.hbm [resolvable:$true] %s1148_s15 }
 0x6a8   : > { %s1146_s18 = sshll.u32 %s1573_s17, 4  ;;  %s1574_s19 = smov [#allocation6]   ;;  %s1147_s18 = int_to_ptr.vmem [resolvable:$true] %s1146_s18 }
 0x6a9   : > { %1318 = dma.vmem_to_hbm [thread:$0]  (%p1280_p5), %s1147_s18, 16, %s1149_s15, [#allocation9]  }
 0x6aa   : > { %s1134_s20 = sshll.u32 %s1574_s19, 4  ;;  %s1136_s23 = sshll.u32 %s2373_s7, 4  ;;  %s1135_s20 = int_to_ptr.vmem [resolvable:$true] %s1134_s20  ;;  %s1137_s23 = int_to_ptr.hbm [resolvable:$true] %s1136_s23 }
 0x6ab   : > { %1316 = dma.vmem_to_hbm [thread:$0]  (%p1280_p5), %s1135_s20, 64, %s1137_s23, [#allocation7]  }
 0x6ac   : > { %s1160_s26 = sshll.u32 %s2375_s9, 4  ;;  %s1575_s27 = smov [#allocation10]   ;;  %s1161_s26 = int_to_ptr.hbm [resolvable:$true] %s1160_s26 }
 0x6ad   : > { %s1158_s28 = sshll.u32 %s1575_s27, 4  ;;  %s1159_s28 = int_to_ptr.vmem [resolvable:$true] %s1158_s28 }
 0x6ae   : > { %1320 = dma.vmem_to_hbm [thread:$0]  (%p1280_p5), %s1159_s28, 16, %s1161_s26, [#allocation9]  }
 0x6af   : > { %1557 = dma.done.wait (%p1280_p5), [#allocation7], 64  }
 0x6b0   : > { %1559 = vsyncadd (%p1280_p5), [#allocation7], 4294967232 }
 0x6b1   : > { %1561 = dma.done.wait (%p1280_p5), [#allocation9], 32  }
 0x6b2   : > { %1563 = vsyncadd (%p1280_p5), [#allocation9], 4294967264 }
 0x6b3 PF: > { %s24_s11 = sadd.s32 1, %s1566_s11  }
 0x6b4   : > { %p21_p7 = scmp.ge.s32.totalorder %s24_s11, 5  }
 0x6b6   :  { %23 = sbr.rel (!%p21_p7) target bundleno = 5 (0x5), region = 105 }
 0x6bb   :  { %1184 = vsyncpa [#allocation7], 1 }
 0x6bc   :  { %1186 = vsyncpa [#allocation7 + $0x1], 1 }
 0x6bd   :  { %1187 = vsyncpa [#allocation9], 1 }

</bundles_post_ra>
